<compile_context>
chip_gen: v7x
topology: tpu7x:2x2x1
jax: 0.10.0
libtpu: 0.0.40
codegen_flags: <defaults>
</compile_context>

<pallas_src>
import jax
import jax.numpy as jnp
from jax import lax
from jax.experimental import pallas as pl
from jax.experimental.pallas import tpu as pltpu
import numpy as np


def _round_up(n, m):
    return ((n + m - 1) // m) * m


def _lstm_value_kernel(x_ref, wih_ref, whh_ref, b_ref,
                       y_ref, v_ref, hx_ref, cx_ref,
                       xp_sc):
    """Single-invocation LSTM + value head. Everything lives in VMEM.

    x_ref   : (T*Bp, Ip)  padded inputs, time-major rows (t*Bp + b)
    wih_ref : (Ip, Gp)    W_ih^T, gate k occupies columns [k*Hp, k*Hp + H)
    whh_ref : (Hp, Gp)    W_hh^T, same gate layout
    b_ref   : (1, Gp)     fused bias (b_ih + b_hh), zero in padded columns
    y_ref   : (T, Bp, Hp) LSTM hidden outputs (pre-ReLU)
    v_ref   : (T, Bp)     sum over hidden of relu(h_t)
    hx_ref  : (Bp, Hp)    final hidden state
    cx_ref  : (Bp, Hp)    final cell state
    xp_sc   : (T*Bp, Gp)  scratch: precomputed input projection
    """
    Hp, Gp = whh_ref.shape
    T, Bp, _ = y_ref.shape

    # Hoisted input projection: ONE matmul for all timesteps (off the serial
    # path), bias broadcast done once.
    xp_sc[...] = (jnp.dot(x_ref[...], wih_ref[...],
                          preferred_element_type=jnp.float32)
                  + b_ref[...])

    h = jnp.zeros((Bp, Hp), jnp.float32)   # PyTorch default: zero initial state
    c = jnp.zeros((Bp, Hp), jnp.float32)

    # Fully-unrolled recurrence (static T): only h @ W_hh^T is on the serial
    # dependency chain. Each per-step tensor is a single (8, 128) vreg.
    for t in range(T):
        gates = xp_sc[t * Bp:(t + 1) * Bp, :] + jnp.dot(
            h, whh_ref[...], preferred_element_type=jnp.float32)

        # Lane-aligned gate slices (offsets 0 / 128 / 256 / 384), PyTorch
        # gate order i, f, g, o. Sigmoid/tanh stay EUP transcendentals.
        i_g = jax.nn.sigmoid(gates[:, 0 * Hp:1 * Hp])
        f_g = jax.nn.sigmoid(gates[:, 1 * Hp:2 * Hp])
        g_g = jnp.tanh(gates[:, 2 * Hp:3 * Hp])
        o_g = jax.nn.sigmoid(gates[:, 3 * Hp:4 * Hp])

        # Padded hidden lanes have pre-activation 0 -> i=f=o=0.5, g=0; starting
        # from c=0 they remain exactly 0 forever, so no garbage reaches the
        # real lanes, the h @ W_hh matmul, or the relu-sum below.
        c = f_g * c + i_g * g_g
        h = o_g * jnp.tanh(c)

        y_ref[t] = h                       # one full-lane, unmasked vreg store

    # Final states stored once, after the loop (not per step).
    hx_ref[...] = h
    cx_ref[...] = c

    # Value head deferred to a single pass: relu + hidden-dim reduction,
    # one store instead of T masked last-dim-1 stores.
    v_ref[...] = jnp.sum(jax.nn.relu(y_ref[...]), axis=-1)


@jax.jit
def value_rnn_forward(x, w_ih, w_hh, b_ih, b_hh):
    """x: (T, B, I) f32.  Weights in PyTorch nn.LSTM layout:
       w_ih (4H, I), w_hh (4H, H), b_ih (4H,), b_hh (4H,).
    Returns (value (T,B,1), (hx (1,B,H), cx (1,B,H)), y (T,B,H))."""
    T, B, I = x.shape
    H = w_hh.shape[1]

    Bp = _round_up(B, 8)       # full sublanes
    Ip = _round_up(I, 8)
    Hp = _round_up(H, 128)     # every gate starts on a 128-lane boundary
    Gp = 4 * Hp

    f32 = jnp.float32
    w_ih = jnp.asarray(w_ih, f32)
    w_hh = jnp.asarray(w_hh, f32)
    b = jnp.asarray(b_ih, f32) + jnp.asarray(b_hh, f32)

    # Pre-transpose + gate-pad the parameters (padded columns/rows are zero).
    wih_p = jnp.zeros((Ip, Gp), f32)
    whh_p = jnp.zeros((Hp, Gp), f32)
    b_p = jnp.zeros((1, Gp), f32)
    for k in range(4):         # PyTorch gate order i, f, g, o
        wih_p = wih_p.at[:I, k * Hp:k * Hp + H].set(w_ih[k * H:(k + 1) * H, :].T)
        whh_p = whh_p.at[:H, k * Hp:k * Hp + H].set(w_hh[k * H:(k + 1) * H, :].T)
        b_p = b_p.at[0, k * Hp:k * Hp + H].set(b[k * H:(k + 1) * H])

    # Pad inputs (batch -> sublanes, channels -> 8) and flatten time-major.
    x_p = jnp.zeros((T, Bp, Ip), f32).at[:, :B, :I].set(x.astype(f32))
    x2d = x_p.reshape(T * Bp, Ip)

    y_p, v_p, hx_p, cx_p = pl.pallas_call(
        _lstm_value_kernel,
        out_shape=(
            jax.ShapeDtypeStruct((T, Bp, Hp), f32),
            jax.ShapeDtypeStruct((T, Bp), f32),
            jax.ShapeDtypeStruct((Bp, Hp), f32),
            jax.ShapeDtypeStruct((Bp, Hp), f32),
        ),
        in_specs=[
            pl.BlockSpec(memory_space=pltpu.MemorySpace.VMEM),
            pl.BlockSpec(memory_space=pltpu.MemorySpace.VMEM),
            pl.BlockSpec(memory_space=pltpu.MemorySpace.VMEM),
            pl.BlockSpec(memory_space=pltpu.MemorySpace.VMEM),
        ],
        out_specs=(
            pl.BlockSpec(memory_space=pltpu.MemorySpace.VMEM),
            pl.BlockSpec(memory_space=pltpu.MemorySpace.VMEM),
            pl.BlockSpec(memory_space=pltpu.MemorySpace.VMEM),
            pl.BlockSpec(memory_space=pltpu.MemorySpace.VMEM),
        ),
        scratch_shapes=[pltpu.VMEM((T * Bp, Gp), f32)],
    )(x2d, wih_p, whh_p, b_p)

    # Strip padding wrapper-side.
    value = v_p[:, :B][:, :, None]          # (T, B, 1)
    y = y_p[:, :B, :H]                      # (T, B, H)
    hx = hx_p[:B, :H][None]                 # (1, B, H)
    cx = cx_p[:B, :H][None]                 # (1, B, H)
    return value, (hx, cx), y


def _reference_forward(x, w_ih, w_hh, b_ih, b_hh):
    """Pure-JAX reference mirroring PyTorch semantics (for correctness check)."""
    T, B, I = x.shape
    H = w_hh.shape[1]

    def step(carry, x_t):
        h, c = carry
        gates = x_t @ w_ih.T + h @ w_hh.T + b_ih + b_hh
        i = jax.nn.sigmoid(gates[:, 0 * H:1 * H])
        f = jax.nn.sigmoid(gates[:, 1 * H:2 * H])
        g = jnp.tanh(gates[:, 2 * H:3 * H])
        o = jax.nn.sigmoid(gates[:, 3 * H:4 * H])
        c = f * c + i * g
        h = o * jnp.tanh(c)
        return (h, c), h

    (h, c), ys = lax.scan(step, (jnp.zeros((B, H)), jnp.zeros((B, H))), x)
    value = jnp.sum(jax.nn.relu(ys), axis=2)[:, :, None]
    return value, (h[None], c[None]), ys


if __name__ == "__main__":
    # Module defaults: input_size=4, hidden_size=15, num_layers=1, output_size=1.
    # TODO(synk): PackedSequence inputs (pad_packed_sequence branch) are not
    # supported; this kernel handles dense time-major (T, B, I) input only.
    T, B, I, H = 8, 2, 4, 15
    key = jax.random.PRNGKey(0)
    kx, k1, k2, k3, k4 = jax.random.split(key, 5)

    # Deterministic synthetic parameters (PyTorch LSTM init: U(-1/sqrt(H), 1/sqrt(H))).
    bound = 1.0 / np.sqrt(H)
    w_ih = jax.random.uniform(k1, (4 * H, I), jnp.float32, -bound, bound)
    w_hh = jax.random.uniform(k2, (4 * H, H), jnp.float32, -bound, bound)
    b_ih = jax.random.uniform(k3, (4 * H,), jnp.float32, -bound, bound)
    b_hh = jax.random.uniform(k4, (4 * H,), jnp.float32, -bound, bound)

    x = jax.random.normal(kx, (T, B, I), jnp.float32)

    value, (hx, cx), y = value_rnn_forward(x, w_ih, w_hh, b_ih, b_hh)
    jax.block_until_ready((value, hx, cx, y))

    # Sanity check against a pure-JAX reference of the same math.
    v_ref, (hx_ref, cx_ref), y_ref = _reference_forward(x, w_ih, w_hh, b_ih, b_hh)
    np.testing.assert_allclose(np.asarray(value), np.asarray(v_ref), rtol=1e-4, atol=1e-4)
    np.testing.assert_allclose(np.asarray(y), np.asarray(y_ref), rtol=1e-4, atol=1e-4)
    np.testing.assert_allclose(np.asarray(hx), np.asarray(hx_ref), rtol=1e-4, atol=1e-4)
    np.testing.assert_allclose(np.asarray(cx), np.asarray(cx_ref), rtol=1e-4, atol=1e-4)

    assert value.shape == (T, B, 1) and hx.shape == (1, B, H) and cx.shape == (1, B, H)
    print("KERNEL_OK")
</pallas_src>

<mosaic_0001>
module attributes {stable_mosaic.version = 11 : i64} {
  func.func @_lstm_value_kernel(%arg0: memref<64x8xf32, #tpu.memory_space<vmem>>, %arg1: memref<8x512xf32, #tpu.memory_space<vmem>>, %arg2: memref<128x512xf32, #tpu.memory_space<vmem>>, %arg3: memref<1x512xf32, #tpu.memory_space<vmem>>, %arg4: memref<8x8x128xf32, #tpu.memory_space<vmem>>, %arg5: memref<8x8xf32, #tpu.memory_space<vmem>>, %arg6: memref<8x128xf32, #tpu.memory_space<vmem>>, %arg7: memref<8x128xf32, #tpu.memory_space<vmem>>, %arg8: memref<64x512xf32, #tpu.memory_space<vmem>>) attributes {dimension_semantics = [], scalar_prefetch = 0 : i64, scratch_operands = 1 : i64, tpu.core_type = #tpu.core_type<tc>} {
    %c0 = arith.constant 0 : index
    %c0_0 = arith.constant 0 : index
    %0 = vector.load %arg0[%c0, %c0_0] : memref<64x8xf32, #tpu.memory_space<vmem>>, vector<64x8xf32>
    %c0_1 = arith.constant 0 : index
    %c0_2 = arith.constant 0 : index
    %1 = vector.load %arg1[%c0_1, %c0_2] : memref<8x512xf32, #tpu.memory_space<vmem>>, vector<8x512xf32>
    %cst = arith.constant dense<0.000000e+00> : vector<64x512xf32>
    %2 = tpu.matmul %0, %1, %cst {dimension_numbers = #tpu.dot_dimension_numbers<[1], [0], [0], [1], [0, 0, 1, 1], [], []>} : vector<64x8xf32>, vector<8x512xf32>, vector<64x512xf32> -> vector<64x512xf32>
    %c0_3 = arith.constant 0 : index
    %c0_4 = arith.constant 0 : index
    %3 = vector.load %arg3[%c0_3, %c0_4] : memref<1x512xf32, #tpu.memory_space<vmem>>, vector<1x512xf32>
    %4 = vector.broadcast %3 : vector<1x512xf32> to vector<64x512xf32>
    %5 = arith.addf %2, %4 : vector<64x512xf32>
    %c0_5 = arith.constant 0 : index
    %c0_6 = arith.constant 0 : index
    %6 = vector.load %arg8[%c0_5, %c0_6] : memref<64x512xf32, #tpu.memory_space<vmem>>, vector<64x512xf32>
    tpu.vector_store %arg8[%c0_5, %c0_6], %5 {strides = array<i32>} : memref<64x512xf32, #tpu.memory_space<vmem>>, vector<64x512xf32>,
    %cst_7 = arith.constant 0.000000e+00 : f32
    %7 = vector.broadcast %cst_7 : f32 to vector<8x128xf32>
    %cst_8 = arith.constant 0.000000e+00 : f32
    %8 = vector.broadcast %cst_8 : f32 to vector<8x128xf32>
    %c0_9 = arith.constant 0 : index
    %c0_10 = arith.constant 0 : index
    %9 = vector.load %arg8[%c0_9, %c0_10] : memref<64x512xf32, #tpu.memory_space<vmem>>, vector<8x512xf32>
    %c0_11 = arith.constant 0 : index
    %c0_12 = arith.constant 0 : index
    %10 = vector.load %arg2[%c0_11, %c0_12] : memref<128x512xf32, #tpu.memory_space<vmem>>, vector<128x512xf32>
    %cst_13 = arith.constant dense<0.000000e+00> : vector<8x512xf32>
    %11 = tpu.matmul %7, %10, %cst_13 {dimension_numbers = #tpu.dot_dimension_numbers<[1], [0], [0], [1], [0, 0, 1, 1], [], []>} : vector<8x128xf32>, vector<128x512xf32>, vector<8x512xf32> -> vector<8x512xf32>
    %12 = arith.addf %9, %11 : vector<8x512xf32>
    %13 = vector.extract_strided_slice %12 {offsets = [0, 0], sizes = [8, 128], strides = [1, 1]} : vector<8x512xf32> to vector<8x128xf32>
    %14 = arith.negf %13 : vector<8x128xf32>
    %15 = math.exp %14 : vector<8x128xf32>
    %cst_14 = arith.constant 1.000000e+00 : f32
    %16 = vector.broadcast %cst_14 : f32 to vector<8x128xf32>
    %17 = arith.addf %16, %15 : vector<8x128xf32>
    %18 = arith.divf %16, %17 : vector<8x128xf32>
    %19 = vector.extract_strided_slice %12 {offsets = [0, 128], sizes = [8, 128], strides = [1, 1]} : vector<8x512xf32> to vector<8x128xf32>
    %20 = arith.negf %19 : vector<8x128xf32>
    %21 = math.exp %20 : vector<8x128xf32>
    %cst_15 = arith.constant 1.000000e+00 : f32
    %22 = vector.broadcast %cst_15 : f32 to vector<8x128xf32>
    %23 = arith.addf %22, %21 : vector<8x128xf32>
    %24 = arith.divf %22, %23 : vector<8x128xf32>
    %25 = vector.extract_strided_slice %12 {offsets = [0, 256], sizes = [8, 128], strides = [1, 1]} : vector<8x512xf32> to vector<8x128xf32>
    %26 = math.tanh %25 : vector<8x128xf32>
    %27 = vector.extract_strided_slice %12 {offsets = [0, 384], sizes = [8, 128], strides = [1, 1]} : vector<8x512xf32> to vector<8x128xf32>
    %28 = arith.negf %27 : vector<8x128xf32>
    %29 = math.exp %28 : vector<8x128xf32>
    %cst_16 = arith.constant 1.000000e+00 : f32
    %30 = vector.broadcast %cst_16 : f32 to vector<8x128xf32>
    %31 = arith.addf %30, %29 : vector<8x128xf32>
    %32 = arith.divf %30, %31 : vector<8x128xf32>
    %33 = arith.mulf %24, %8 : vector<8x128xf32>
    %34 = arith.mulf %18, %26 : vector<8x128xf32>
    %35 = arith.addf %33, %34 : vector<8x128xf32>
    %36 = math.tanh %35 : vector<8x128xf32>
    %37 = arith.mulf %32, %36 : vector<8x128xf32>
    %c0_17 = arith.constant 0 : index
    %c0_18 = arith.constant 0 : index
    %c0_19 = arith.constant 0 : index
    %38 = vector.load %arg4[%c0_17, %c0_18, %c0_19] : memref<8x8x128xf32, #tpu.memory_space<vmem>>, vector<1x8x128xf32>
    %39 = vector.shape_cast %38 : vector<1x8x128xf32> to vector<8x128xf32>
    %40 = vector.shape_cast %37 : vector<8x128xf32> to vector<1x8x128xf32>
    tpu.vector_store %arg4[%c0_17, %c0_18, %c0_19], %40 {strides = array<i32>} : memref<8x8x128xf32, #tpu.memory_space<vmem>>, vector<1x8x128xf32>,
    %c8 = arith.constant 8 : index
    %c0_20 = arith.constant 0 : index
    %41 = vector.load %arg8[%c8, %c0_20] : memref<64x512xf32, #tpu.memory_space<vmem>>, vector<8x512xf32>
    %c0_21 = arith.constant 0 : index
    %c0_22 = arith.constant 0 : index
    %42 = vector.load %arg2[%c0_21, %c0_22] : memref<128x512xf32, #tpu.memory_space<vmem>>, vector<128x512xf32>
    %cst_23 = arith.constant dense<0.000000e+00> : vector<8x512xf32>
    %43 = tpu.matmul %37, %42, %cst_23 {dimension_numbers = #tpu.dot_dimension_numbers<[1], [0], [0], [1], [0, 0, 1, 1], [], []>} : vector<8x128xf32>, vector<128x512xf32>, vector<8x512xf32> -> vector<8x512xf32>
    %44 = arith.addf %41, %43 : vector<8x512xf32>
    %45 = vector.extract_strided_slice %44 {offsets = [0, 0], sizes = [8, 128], strides = [1, 1]} : vector<8x512xf32> to vector<8x128xf32>
    %46 = arith.negf %45 : vector<8x128xf32>
    %47 = math.exp %46 : vector<8x128xf32>
    %cst_24 = arith.constant 1.000000e+00 : f32
    %48 = vector.broadcast %cst_24 : f32 to vector<8x128xf32>
    %49 = arith.addf %48, %47 : vector<8x128xf32>
    %50 = arith.divf %48, %49 : vector<8x128xf32>
    %51 = vector.extract_strided_slice %44 {offsets = [0, 128], sizes = [8, 128], strides = [1, 1]} : vector<8x512xf32> to vector<8x128xf32>
    %52 = arith.negf %51 : vector<8x128xf32>
    %53 = math.exp %52 : vector<8x128xf32>
    %cst_25 = arith.constant 1.000000e+00 : f32
    %54 = vector.broadcast %cst_25 : f32 to vector<8x128xf32>
    %55 = arith.addf %54, %53 : vector<8x128xf32>
    %56 = arith.divf %54, %55 : vector<8x128xf32>
    %57 = vector.extract_strided_slice %44 {offsets = [0, 256], sizes = [8, 128], strides = [1, 1]} : vector<8x512xf32> to vector<8x128xf32>
    %58 = math.tanh %57 : vector<8x128xf32>
    %59 = vector.extract_strided_slice %44 {offsets = [0, 384], sizes = [8, 128], strides = [1, 1]} : vector<8x512xf32> to vector<8x128xf32>
    %60 = arith.negf %59 : vector<8x128xf32>
    %61 = math.exp %60 : vector<8x128xf32>
    %cst_26 = arith.constant 1.000000e+00 : f32
    %62 = vector.broadcast %cst_26 : f32 to vector<8x128xf32>
    %63 = arith.addf %62, %61 : vector<8x128xf32>
    %64 = arith.divf %62, %63 : vector<8x128xf32>
    %65 = arith.mulf %56, %35 : vector<8x128xf32>
    %66 = arith.mulf %50, %58 : vector<8x128xf32>
    %67 = arith.addf %65, %66 : vector<8x128xf32>
    %68 = math.tanh %67 : vector<8x128xf32>
    %69 = arith.mulf %64, %68 : vector<8x128xf32>
    %c1 = arith.constant 1 : index
    %c0_27 = arith.constant 0 : index
    %c0_28 = arith.constant 0 : index
    %70 = vector.load %arg4[%c1, %c0_27, %c0_28] : memref<8x8x128xf32, #tpu.memory_space<vmem>>, vector<1x8x128xf32>
    %71 = vector.shape_cast %70 : vector<1x8x128xf32> to vector<8x128xf32>
    %72 = vector.shape_cast %69 : vector<8x128xf32> to vector<1x8x128xf32>
    tpu.vector_store %arg4[%c1, %c0_27, %c0_28], %72 {strides = array<i32>} : memref<8x8x128xf32, #tpu.memory_space<vmem>>, vector<1x8x128xf32>,
    %c16 = arith.constant 16 : index
    %c0_29 = arith.constant 0 : index
    %73 = vector.load %arg8[%c16, %c0_29] : memref<64x512xf32, #tpu.memory_space<vmem>>, vector<8x512xf32>
    %c0_30 = arith.constant 0 : index
    %c0_31 = arith.constant 0 : index
    %74 = vector.load %arg2[%c0_30, %c0_31] : memref<128x512xf32, #tpu.memory_space<vmem>>, vector<128x512xf32>
    %cst_32 = arith.constant dense<0.000000e+00> : vector<8x512xf32>
    %75 = tpu.matmul %69, %74, %cst_32 {dimension_numbers = #tpu.dot_dimension_numbers<[1], [0], [0], [1], [0, 0, 1, 1], [], []>} : vector<8x128xf32>, vector<128x512xf32>, vector<8x512xf32> -> vector<8x512xf32>
    %76 = arith.addf %73, %75 : vector<8x512xf32>
    %77 = vector.extract_strided_slice %76 {offsets = [0, 0], sizes = [8, 128], strides = [1, 1]} : vector<8x512xf32> to vector<8x128xf32>
    %78 = arith.negf %77 : vector<8x128xf32>
    %79 = math.exp %78 : vector<8x128xf32>
    %cst_33 = arith.constant 1.000000e+00 : f32
    %80 = vector.broadcast %cst_33 : f32 to vector<8x128xf32>
    %81 = arith.addf %80, %79 : vector<8x128xf32>
    %82 = arith.divf %80, %81 : vector<8x128xf32>
    %83 = vector.extract_strided_slice %76 {offsets = [0, 128], sizes = [8, 128], strides = [1, 1]} : vector<8x512xf32> to vector<8x128xf32>
    %84 = arith.negf %83 : vector<8x128xf32>
    %85 = math.exp %84 : vector<8x128xf32>
    %cst_34 = arith.constant 1.000000e+00 : f32
    %86 = vector.broadcast %cst_34 : f32 to vector<8x128xf32>
    %87 = arith.addf %86, %85 : vector<8x128xf32>
    %88 = arith.divf %86, %87 : vector<8x128xf32>
    %89 = vector.extract_strided_slice %76 {offsets = [0, 256], sizes = [8, 128], strides = [1, 1]} : vector<8x512xf32> to vector<8x128xf32>
    %90 = math.tanh %89 : vector<8x128xf32>
    %91 = vector.extract_strided_slice %76 {offsets = [0, 384], sizes = [8, 128], strides = [1, 1]} : vector<8x512xf32> to vector<8x128xf32>
    %92 = arith.negf %91 : vector<8x128xf32>
    %93 = math.exp %92 : vector<8x128xf32>
    %cst_35 = arith.constant 1.000000e+00 : f32
    %94 = vector.broadcast %cst_35 : f32 to vector<8x128xf32>
    %95 = arith.addf %94, %93 : vector<8x128xf32>
    %96 = arith.divf %94, %95 : vector<8x128xf32>
    %97 = arith.mulf %88, %67 : vector<8x128xf32>
    %98 = arith.mulf %82, %90 : vector<8x128xf32>
    %99 = arith.addf %97, %98 : vector<8x128xf32>
    %100 = math.tanh %99 : vector<8x128xf32>
    %101 = arith.mulf %96, %100 : vector<8x128xf32>
    %c2 = arith.constant 2 : index
    %c0_36 = arith.constant 0 : index
    %c0_37 = arith.constant 0 : index
    %102 = vector.load %arg4[%c2, %c0_36, %c0_37] : memref<8x8x128xf32, #tpu.memory_space<vmem>>, vector<1x8x128xf32>
    %103 = vector.shape_cast %102 : vector<1x8x128xf32> to vector<8x128xf32>
    %104 = vector.shape_cast %101 : vector<8x128xf32> to vector<1x8x128xf32>
    tpu.vector_store %arg4[%c2, %c0_36, %c0_37], %104 {strides = array<i32>} : memref<8x8x128xf32, #tpu.memory_space<vmem>>, vector<1x8x128xf32>,
    %c24 = arith.constant 24 : index
    %c0_38 = arith.constant 0 : index
    %105 = vector.load %arg8[%c24, %c0_38] : memref<64x512xf32, #tpu.memory_space<vmem>>, vector<8x512xf32>
    %c0_39 = arith.constant 0 : index
    %c0_40 = arith.constant 0 : index
    %106 = vector.load %arg2[%c0_39, %c0_40] : memref<128x512xf32, #tpu.memory_space<vmem>>, vector<128x512xf32>
    %cst_41 = arith.constant dense<0.000000e+00> : vector<8x512xf32>
    %107 = tpu.matmul %101, %106, %cst_41 {dimension_numbers = #tpu.dot_dimension_numbers<[1], [0], [0], [1], [0, 0, 1, 1], [], []>} : vector<8x128xf32>, vector<128x512xf32>, vector<8x512xf32> -> vector<8x512xf32>
    %108 = arith.addf %105, %107 : vector<8x512xf32>
    %109 = vector.extract_strided_slice %108 {offsets = [0, 0], sizes = [8, 128], strides = [1, 1]} : vector<8x512xf32> to vector<8x128xf32>
    %110 = arith.negf %109 : vector<8x128xf32>
    %111 = math.exp %110 : vector<8x128xf32>
    %cst_42 = arith.constant 1.000000e+00 : f32
    %112 = vector.broadcast %cst_42 : f32 to vector<8x128xf32>
    %113 = arith.addf %112, %111 : vector<8x128xf32>
    %114 = arith.divf %112, %113 : vector<8x128xf32>
    %115 = vector.extract_strided_slice %108 {offsets = [0, 128], sizes = [8, 128], strides = [1, 1]} : vector<8x512xf32> to vector<8x128xf32>
    %116 = arith.negf %115 : vector<8x128xf32>
    %117 = math.exp %116 : vector<8x128xf32>
    %cst_43 = arith.constant 1.000000e+00 : f32
    %118 = vector.broadcast %cst_43 : f32 to vector<8x128xf32>
    %119 = arith.addf %118, %117 : vector<8x128xf32>
    %120 = arith.divf %118, %119 : vector<8x128xf32>
    %121 = vector.extract_strided_slice %108 {offsets = [0, 256], sizes = [8, 128], strides = [1, 1]} : vector<8x512xf32> to vector<8x128xf32>
    %122 = math.tanh %121 : vector<8x128xf32>
    %123 = vector.extract_strided_slice %108 {offsets = [0, 384], sizes = [8, 128], strides = [1, 1]} : vector<8x512xf32> to vector<8x128xf32>
    %124 = arith.negf %123 : vector<8x128xf32>
    %125 = math.exp %124 : vector<8x128xf32>
    %cst_44 = arith.constant 1.000000e+00 : f32
    %126 = vector.broadcast %cst_44 : f32 to vector<8x128xf32>
    %127 = arith.addf %126, %125 : vector<8x128xf32>
    %128 = arith.divf %126, %127 : vector<8x128xf32>
    %129 = arith.mulf %120, %99 : vector<8x128xf32>
    %130 = arith.mulf %114, %122 : vector<8x128xf32>
    %131 = arith.addf %129, %130 : vector<8x128xf32>
    %132 = math.tanh %131 : vector<8x128xf32>
    %133 = arith.mulf %128, %132 : vector<8x128xf32>
    %c3 = arith.constant 3 : index
    %c0_45 = arith.constant 0 : index
    %c0_46 = arith.constant 0 : index
    %134 = vector.load %arg4[%c3, %c0_45, %c0_46] : memref<8x8x128xf32, #tpu.memory_space<vmem>>, vector<1x8x128xf32>
    %135 = vector.shape_cast %134 : vector<1x8x128xf32> to vector<8x128xf32>
    %136 = vector.shape_cast %133 : vector<8x128xf32> to vector<1x8x128xf32>
    tpu.vector_store %arg4[%c3, %c0_45, %c0_46], %136 {strides = array<i32>} : memref<8x8x128xf32, #tpu.memory_space<vmem>>, vector<1x8x128xf32>,
    %c32 = arith.constant 32 : index
    %c0_47 = arith.constant 0 : index
    %137 = vector.load %arg8[%c32, %c0_47] : memref<64x512xf32, #tpu.memory_space<vmem>>, vector<8x512xf32>
    %c0_48 = arith.constant 0 : index
    %c0_49 = arith.constant 0 : index
    %138 = vector.load %arg2[%c0_48, %c0_49] : memref<128x512xf32, #tpu.memory_space<vmem>>, vector<128x512xf32>
    %cst_50 = arith.constant dense<0.000000e+00> : vector<8x512xf32>
    %139 = tpu.matmul %133, %138, %cst_50 {dimension_numbers = #tpu.dot_dimension_numbers<[1], [0], [0], [1], [0, 0, 1, 1], [], []>} : vector<8x128xf32>, vector<128x512xf32>, vector<8x512xf32> -> vector<8x512xf32>
    %140 = arith.addf %137, %139 : vector<8x512xf32>
    %141 = vector.extract_strided_slice %140 {offsets = [0, 0], sizes = [8, 128], strides = [1, 1]} : vector<8x512xf32> to vector<8x128xf32>
    %142 = arith.negf %141 : vector<8x128xf32>
    %143 = math.exp %142 : vector<8x128xf32>
    %cst_51 = arith.constant 1.000000e+00 : f32
    %144 = vector.broadcast %cst_51 : f32 to vector<8x128xf32>
    %145 = arith.addf %144, %143 : vector<8x128xf32>
    %146 = arith.divf %144, %145 : vector<8x128xf32>
    %147 = vector.extract_strided_slice %140 {offsets = [0, 128], sizes = [8, 128], strides = [1, 1]} : vector<8x512xf32> to vector<8x128xf32>
    %148 = arith.negf %147 : vector<8x128xf32>
    %149 = math.exp %148 : vector<8x128xf32>
    %cst_52 = arith.constant 1.000000e+00 : f32
    %150 = vector.broadcast %cst_52 : f32 to vector<8x128xf32>
    %151 = arith.addf %150, %149 : vector<8x128xf32>
    %152 = arith.divf %150, %151 : vector<8x128xf32>
    %153 = vector.extract_strided_slice %140 {offsets = [0, 256], sizes = [8, 128], strides = [1, 1]} : vector<8x512xf32> to vector<8x128xf32>
    %154 = math.tanh %153 : vector<8x128xf32>
    %155 = vector.extract_strided_slice %140 {offsets = [0, 384], sizes = [8, 128], strides = [1, 1]} : vector<8x512xf32> to vector<8x128xf32>
    %156 = arith.negf %155 : vector<8x128xf32>
    %157 = math.exp %156 : vector<8x128xf32>
    %cst_53 = arith.constant 1.000000e+00 : f32
    %158 = vector.broadcast %cst_53 : f32 to vector<8x128xf32>
    %159 = arith.addf %158, %157 : vector<8x128xf32>
    %160 = arith.divf %158, %159 : vector<8x128xf32>
    %161 = arith.mulf %152, %131 : vector<8x128xf32>
    %162 = arith.mulf %146, %154 : vector<8x128xf32>
    %163 = arith.addf %161, %162 : vector<8x128xf32>
    %164 = math.tanh %163 : vector<8x128xf32>
    %165 = arith.mulf %160, %164 : vector<8x128xf32>
    %c4 = arith.constant 4 : index
    %c0_54 = arith.constant 0 : index
    %c0_55 = arith.constant 0 : index
    %166 = vector.load %arg4[%c4, %c0_54, %c0_55] : memref<8x8x128xf32, #tpu.memory_space<vmem>>, vector<1x8x128xf32>
    %167 = vector.shape_cast %166 : vector<1x8x128xf32> to vector<8x128xf32>
    %168 = vector.shape_cast %165 : vector<8x128xf32> to vector<1x8x128xf32>
    tpu.vector_store %arg4[%c4, %c0_54, %c0_55], %168 {strides = array<i32>} : memref<8x8x128xf32, #tpu.memory_space<vmem>>, vector<1x8x128xf32>,
    %c40 = arith.constant 40 : index
    %c0_56 = arith.constant 0 : index
    %169 = vector.load %arg8[%c40, %c0_56] : memref<64x512xf32, #tpu.memory_space<vmem>>, vector<8x512xf32>
    %c0_57 = arith.constant 0 : index
    %c0_58 = arith.constant 0 : index
    %170 = vector.load %arg2[%c0_57, %c0_58] : memref<128x512xf32, #tpu.memory_space<vmem>>, vector<128x512xf32>
    %cst_59 = arith.constant dense<0.000000e+00> : vector<8x512xf32>
    %171 = tpu.matmul %165, %170, %cst_59 {dimension_numbers = #tpu.dot_dimension_numbers<[1], [0], [0], [1], [0, 0, 1, 1], [], []>} : vector<8x128xf32>, vector<128x512xf32>, vector<8x512xf32> -> vector<8x512xf32>
    %172 = arith.addf %169, %171 : vector<8x512xf32>
    %173 = vector.extract_strided_slice %172 {offsets = [0, 0], sizes = [8, 128], strides = [1, 1]} : vector<8x512xf32> to vector<8x128xf32>
    %174 = arith.negf %173 : vector<8x128xf32>
    %175 = math.exp %174 : vector<8x128xf32>
    %cst_60 = arith.constant 1.000000e+00 : f32
    %176 = vector.broadcast %cst_60 : f32 to vector<8x128xf32>
    %177 = arith.addf %176, %175 : vector<8x128xf32>
    %178 = arith.divf %176, %177 : vector<8x128xf32>
    %179 = vector.extract_strided_slice %172 {offsets = [0, 128], sizes = [8, 128], strides = [1, 1]} : vector<8x512xf32> to vector<8x128xf32>
    %180 = arith.negf %179 : vector<8x128xf32>
    %181 = math.exp %180 : vector<8x128xf32>
    %cst_61 = arith.constant 1.000000e+00 : f32
    %182 = vector.broadcast %cst_61 : f32 to vector<8x128xf32>
    %183 = arith.addf %182, %181 : vector<8x128xf32>
    %184 = arith.divf %182, %183 : vector<8x128xf32>
    %185 = vector.extract_strided_slice %172 {offsets = [0, 256], sizes = [8, 128], strides = [1, 1]} : vector<8x512xf32> to vector<8x128xf32>
    %186 = math.tanh %185 : vector<8x128xf32>
    %187 = vector.extract_strided_slice %172 {offsets = [0, 384], sizes = [8, 128], strides = [1, 1]} : vector<8x512xf32> to vector<8x128xf32>
    %188 = arith.negf %187 : vector<8x128xf32>
    %189 = math.exp %188 : vector<8x128xf32>
    %cst_62 = arith.constant 1.000000e+00 : f32
    %190 = vector.broadcast %cst_62 : f32 to vector<8x128xf32>
    %191 = arith.addf %190, %189 : vector<8x128xf32>
    %192 = arith.divf %190, %191 : vector<8x128xf32>
    %193 = arith.mulf %184, %163 : vector<8x128xf32>
    %194 = arith.mulf %178, %186 : vector<8x128xf32>
    %195 = arith.addf %193, %194 : vector<8x128xf32>
    %196 = math.tanh %195 : vector<8x128xf32>
    %197 = arith.mulf %192, %196 : vector<8x128xf32>
    %c5 = arith.constant 5 : index
    %c0_63 = arith.constant 0 : index
    %c0_64 = arith.constant 0 : index
    %198 = vector.load %arg4[%c5, %c0_63, %c0_64] : memref<8x8x128xf32, #tpu.memory_space<vmem>>, vector<1x8x128xf32>
    %199 = vector.shape_cast %198 : vector<1x8x128xf32> to vector<8x128xf32>
    %200 = vector.shape_cast %197 : vector<8x128xf32> to vector<1x8x128xf32>
    tpu.vector_store %arg4[%c5, %c0_63, %c0_64], %200 {strides = array<i32>} : memref<8x8x128xf32, #tpu.memory_space<vmem>>, vector<1x8x128xf32>,
    %c48 = arith.constant 48 : index
    %c0_65 = arith.constant 0 : index
    %201 = vector.load %arg8[%c48, %c0_65] : memref<64x512xf32, #tpu.memory_space<vmem>>, vector<8x512xf32>
    %c0_66 = arith.constant 0 : index
    %c0_67 = arith.constant 0 : index
    %202 = vector.load %arg2[%c0_66, %c0_67] : memref<128x512xf32, #tpu.memory_space<vmem>>, vector<128x512xf32>
    %cst_68 = arith.constant dense<0.000000e+00> : vector<8x512xf32>
    %203 = tpu.matmul %197, %202, %cst_68 {dimension_numbers = #tpu.dot_dimension_numbers<[1], [0], [0], [1], [0, 0, 1, 1], [], []>} : vector<8x128xf32>, vector<128x512xf32>, vector<8x512xf32> -> vector<8x512xf32>
    %204 = arith.addf %201, %203 : vector<8x512xf32>
    %205 = vector.extract_strided_slice %204 {offsets = [0, 0], sizes = [8, 128], strides = [1, 1]} : vector<8x512xf32> to vector<8x128xf32>
    %206 = arith.negf %205 : vector<8x128xf32>
    %207 = math.exp %206 : vector<8x128xf32>
    %cst_69 = arith.constant 1.000000e+00 : f32
    %208 = vector.broadcast %cst_69 : f32 to vector<8x128xf32>
    %209 = arith.addf %208, %207 : vector<8x128xf32>
    %210 = arith.divf %208, %209 : vector<8x128xf32>
    %211 = vector.extract_strided_slice %204 {offsets = [0, 128], sizes = [8, 128], strides = [1, 1]} : vector<8x512xf32> to vector<8x128xf32>
    %212 = arith.negf %211 : vector<8x128xf32>
    %213 = math.exp %212 : vector<8x128xf32>
    %cst_70 = arith.constant 1.000000e+00 : f32
    %214 = vector.broadcast %cst_70 : f32 to vector<8x128xf32>
    %215 = arith.addf %214, %213 : vector<8x128xf32>
    %216 = arith.divf %214, %215 : vector<8x128xf32>
    %217 = vector.extract_strided_slice %204 {offsets = [0, 256], sizes = [8, 128], strides = [1, 1]} : vector<8x512xf32> to vector<8x128xf32>
    %218 = math.tanh %217 : vector<8x128xf32>
    %219 = vector.extract_strided_slice %204 {offsets = [0, 384], sizes = [8, 128], strides = [1, 1]} : vector<8x512xf32> to vector<8x128xf32>
    %220 = arith.negf %219 : vector<8x128xf32>
    %221 = math.exp %220 : vector<8x128xf32>
    %cst_71 = arith.constant 1.000000e+00 : f32
    %222 = vector.broadcast %cst_71 : f32 to vector<8x128xf32>
    %223 = arith.addf %222, %221 : vector<8x128xf32>
    %224 = arith.divf %222, %223 : vector<8x128xf32>
    %225 = arith.mulf %216, %195 : vector<8x128xf32>
    %226 = arith.mulf %210, %218 : vector<8x128xf32>
    %227 = arith.addf %225, %226 : vector<8x128xf32>
    %228 = math.tanh %227 : vector<8x128xf32>
    %229 = arith.mulf %224, %228 : vector<8x128xf32>
    %c6 = arith.constant 6 : index
    %c0_72 = arith.constant 0 : index
    %c0_73 = arith.constant 0 : index
    %230 = vector.load %arg4[%c6, %c0_72, %c0_73] : memref<8x8x128xf32, #tpu.memory_space<vmem>>, vector<1x8x128xf32>
    %231 = vector.shape_cast %230 : vector<1x8x128xf32> to vector<8x128xf32>
    %232 = vector.shape_cast %229 : vector<8x128xf32> to vector<1x8x128xf32>
    tpu.vector_store %arg4[%c6, %c0_72, %c0_73], %232 {strides = array<i32>} : memref<8x8x128xf32, #tpu.memory_space<vmem>>, vector<1x8x128xf32>,
    %c56 = arith.constant 56 : index
    %c0_74 = arith.constant 0 : index
    %233 = vector.load %arg8[%c56, %c0_74] : memref<64x512xf32, #tpu.memory_space<vmem>>, vector<8x512xf32>
    %c0_75 = arith.constant 0 : index
    %c0_76 = arith.constant 0 : index
    %234 = vector.load %arg2[%c0_75, %c0_76] : memref<128x512xf32, #tpu.memory_space<vmem>>, vector<128x512xf32>
    %cst_77 = arith.constant dense<0.000000e+00> : vector<8x512xf32>
    %235 = tpu.matmul %229, %234, %cst_77 {dimension_numbers = #tpu.dot_dimension_numbers<[1], [0], [0], [1], [0, 0, 1, 1], [], []>} : vector<8x128xf32>, vector<128x512xf32>, vector<8x512xf32> -> vector<8x512xf32>
    %236 = arith.addf %233, %235 : vector<8x512xf32>
    %237 = vector.extract_strided_slice %236 {offsets = [0, 0], sizes = [8, 128], strides = [1, 1]} : vector<8x512xf32> to vector<8x128xf32>
    %238 = arith.negf %237 : vector<8x128xf32>
    %239 = math.exp %238 : vector<8x128xf32>
    %cst_78 = arith.constant 1.000000e+00 : f32
    %240 = vector.broadcast %cst_78 : f32 to vector<8x128xf32>
    %241 = arith.addf %240, %239 : vector<8x128xf32>
    %242 = arith.divf %240, %241 : vector<8x128xf32>
    %243 = vector.extract_strided_slice %236 {offsets = [0, 128], sizes = [8, 128], strides = [1, 1]} : vector<8x512xf32> to vector<8x128xf32>
    %244 = arith.negf %243 : vector<8x128xf32>
    %245 = math.exp %244 : vector<8x128xf32>
    %cst_79 = arith.constant 1.000000e+00 : f32
    %246 = vector.broadcast %cst_79 : f32 to vector<8x128xf32>
    %247 = arith.addf %246, %245 : vector<8x128xf32>
    %248 = arith.divf %246, %247 : vector<8x128xf32>
    %249 = vector.extract_strided_slice %236 {offsets = [0, 256], sizes = [8, 128], strides = [1, 1]} : vector<8x512xf32> to vector<8x128xf32>
    %250 = math.tanh %249 : vector<8x128xf32>
    %251 = vector.extract_strided_slice %236 {offsets = [0, 384], sizes = [8, 128], strides = [1, 1]} : vector<8x512xf32> to vector<8x128xf32>
    %252 = arith.negf %251 : vector<8x128xf32>
    %253 = math.exp %252 : vector<8x128xf32>
    %cst_80 = arith.constant 1.000000e+00 : f32
    %254 = vector.broadcast %cst_80 : f32 to vector<8x128xf32>
    %255 = arith.addf %254, %253 : vector<8x128xf32>
    %256 = arith.divf %254, %255 : vector<8x128xf32>
    %257 = arith.mulf %248, %227 : vector<8x128xf32>
    %258 = arith.mulf %242, %250 : vector<8x128xf32>
    %259 = arith.addf %257, %258 : vector<8x128xf32>
    %260 = math.tanh %259 : vector<8x128xf32>
    %261 = arith.mulf %256, %260 : vector<8x128xf32>
    %c7 = arith.constant 7 : index
    %c0_81 = arith.constant 0 : index
    %c0_82 = arith.constant 0 : index
    %262 = vector.load %arg4[%c7, %c0_81, %c0_82] : memref<8x8x128xf32, #tpu.memory_space<vmem>>, vector<1x8x128xf32>
    %263 = vector.shape_cast %262 : vector<1x8x128xf32> to vector<8x128xf32>
    %264 = vector.shape_cast %261 : vector<8x128xf32> to vector<1x8x128xf32>
    tpu.vector_store %arg4[%c7, %c0_81, %c0_82], %264 {strides = array<i32>} : memref<8x8x128xf32, #tpu.memory_space<vmem>>, vector<1x8x128xf32>,
    %c0_83 = arith.constant 0 : index
    %c0_84 = arith.constant 0 : index
    %265 = vector.load %arg6[%c0_83, %c0_84] : memref<8x128xf32, #tpu.memory_space<vmem>>, vector<8x128xf32>
    tpu.vector_store %arg6[%c0_83, %c0_84], %261 {strides = array<i32>} : memref<8x128xf32, #tpu.memory_space<vmem>>, vector<8x128xf32>,
    %c0_85 = arith.constant 0 : index
    %c0_86 = arith.constant 0 : index
    %266 = vector.load %arg7[%c0_85, %c0_86] : memref<8x128xf32, #tpu.memory_space<vmem>>, vector<8x128xf32>
    tpu.vector_store %arg7[%c0_85, %c0_86], %259 {strides = array<i32>} : memref<8x128xf32, #tpu.memory_space<vmem>>, vector<8x128xf32>,
    %c0_87 = arith.constant 0 : index
    %c0_88 = arith.constant 0 : index
    %c0_89 = arith.constant 0 : index
    %267 = vector.load %arg4[%c0_87, %c0_88, %c0_89] : memref<8x8x128xf32, #tpu.memory_space<vmem>>, vector<8x8x128xf32>
    %cst_90 = arith.constant 0.000000e+00 : f32
    %268 = vector.broadcast %cst_90 : f32 to vector<8x8x128xf32>
    %269 = arith.maximumf %267, %268 : vector<8x8x128xf32>
    %cst_91 = arith.constant dense<0.000000e+00> : vector<8x8xf32>
    %270 = vector.multi_reduction <add>, %269, %cst_91 [2] : vector<8x8x128xf32> to vector<8x8xf32>
    %c0_92 = arith.constant 0 : index
    %c0_93 = arith.constant 0 : index
    %271 = vector.load %arg5[%c0_92, %c0_93] : memref<8x8xf32, #tpu.memory_space<vmem>>, vector<8x8xf32>
    tpu.vector_store %arg5[%c0_92, %c0_93], %270 {strides = array<i32>} : memref<8x8xf32, #tpu.memory_space<vmem>>, vector<8x8xf32>,
    return
  }
}

</mosaic_0001>

<bundles_post_ra>
// kernel: value_rnn_forward.1
= control target key start
LH: loop header
LB: loop body
LE: loop exit
PB: predicated region body
PF: predicated region fallthrough
CT: control target
= control target key end

     0   :  { %v3117_v3 = vmov 0.0   ;;  %vm55_vm0 = vcmask 64512   ;;  %vm2333_vm1 = vcmask 1041409   ;;  %vm2335_vm2 = vcmask 1042434   ;;  %s4222_s1 = inlined_call_operand.vmem [shape: f32[8,512], index: 1, kind: input, shape index: {}]   ;;  %s4223_s0 = inlined_call_operand.vmem [shape: f32[64,8], index: 0, kind: input, shape index: {}]   ;;  %s4224_s2 = inlined_call_operand.vmem [shape: f32[128,512], index: 2, kind: input, shape index: {}]   ;;  %s4225_s3 = inlined_call_operand.vmem [shape: f32[1,512], index: 3, kind: input, shape index: {}]   ;;  %s4226_s4 = inlined_call_operand.vmem [shape: f32[8,8,128], index: 4, kind: output, shape index: {0}]   ;;  %s4227_s7 = inlined_call_operand.vmem [shape: f32[8,128], index: 7, kind: output, shape index: {3}]   ;;  %s4228_s6 = inlined_call_operand.vmem [shape: f32[8,128], index: 6, kind: output, shape index: {2}]   ;;  %s4229_s5 = inlined_call_operand.vmem [shape: f32[8,8], index: 5, kind: output, shape index: {1}]  }
   0x1   :  { %v30_v0 = vld [vmem:[%s4222_s1 + $0x8] sm:$0xff]  ;;  %v32_v1 = vld [vmem:[%s4222_s1 + $0x18] sm:$0xff]  ;;  %v29_v2 = vld [vmem:[%s4222_s1] sm:$0xff]  ;;  %144 = vmatprep.mubr.f32.mxu0 %v3117_v3  ;;  %257 = vmatprep.mubr.f32.mxu1 %v3117_v3  ;;  %vm2337_vm3 = vcmask 1043459   ;;  %vm2339_vm4 = vcmask 1044484   ;;  %vm2341_vm5 = vcmask 1045509  }
   0x2   :  { %80 = vmatprep.subr.mxu0 %v30_v0  ;;  %193 = vmatprep.subr.mxu1 %v32_v1  ;;  %v31_v4 = vld [vmem:[%s4222_s1 + $0x10] sm:$0xff]  ;;  %v21_v5 = vld [vmem:[%s4223_s0] sm:$0xff]  ;;  %v343_v6 = vld [vmem:[%s4224_s2 + $0x8] sm:$0xff]  ;;  %vm2343_vm6 = vcmask 1046534   ;;  %vm2345_vm7 = vcmask 1047559  }
   0x3   :  { %81 = vmatpush1.msra.mxu0 %v29_v2  ;;  %194 = vmatpush1.msra.mxu1 %v31_v4  ;;  %v347_v7 = vld [vmem:[%s4224_s2 + $0x28] sm:$0xff]  ;;  %v345_v8 = vld [vmem:[%s4224_s2 + $0x18] sm:$0xff]  ;;  %v342_v12 = vld [vmem:[%s4224_s2] sm:$0xff] }
   0x4   :  { %v349_v9 = vld [vmem:[%s4224_s2 + $0x38] sm:$0xff]  ;;  %2365 = vmatmul.mubr.msk.f32.vlgmr.msra.gmra.mrb[0].mxu0 %vm55_vm0, %v21_v5  ;;  %2373 = vmatmul.mubr.msk.f32.vlgmr.msra.gmra.mrb[0].mxu1 %vm55_vm0, %v21_v5  ;;  %v3189_v10 = vpack.c.bf16 %v347_v7, %v343_v6  ;;  %v346_v13 = vld [vmem:[%s4224_s2 + $0x20] sm:$0xff]  ;;  %v344_v14 = vld [vmem:[%s4224_s2 + $0x10] sm:$0xff] }
   0x5   :  { %v3191_v11 = vpack.c.bf16 %v349_v9, %v345_v8  ;;  %v3202_v15 = vpack.c.bf16 %v346_v13, %v342_v12  ;;  %v348_v16 = vld [vmem:[%s4224_s2 + $0x30] sm:$0xff]  ;;  %150 = vmatprep.mubr.f32.mxu0 %v3117_v3  ;;  %263 = vmatprep.mubr.f32.mxu1 %v3117_v3  ;;  %v22_v17 = vld [vmem:[%s4223_s0 + $0x8] sm:$0xff]  ;;  %v353_v21 = vld [vmem:[%s4224_s2 + $0x58] sm:$0xff] }
   0x6   :  { %v351_v18 = vld [vmem:[%s4224_s2 + $0x48] sm:$0xff]  ;;  %2413 = vmatprep.subr.bf16.mxu0 %v3189_v10  ;;  %v3217_v19 = vpack.c.bf16 %v348_v16, %v344_v14  ;;  %v357_v22 = vld [vmem:[%s4224_s2 + $0x78] sm:$0xff]  ;;  %v350_v25 = vld [vmem:[%s4224_s2 + $0x40] sm:$0xff] }
   0x7   :  { %2445 = vmatprep.subr.bf16.mxu1 %v3191_v11  ;;  %v355_v20 = vld [vmem:[%s4224_s2 + $0x68] sm:$0xff]  ;;  %2415 = vmatpush1.bf16.msra.mxu0 %v3202_v15  ;;  %v3231_v24 = vpack.c.bf16 %v357_v22, %v353_v21  ;;  %v354_v26 = vld [vmem:[%s4224_s2 + $0x60] sm:$0xff]  ;;  %v352_v27 = vld [vmem:[%s4224_s2 + $0x50] sm:$0xff] }
   0x8   :  { %v3229_v23 = vpack.c.bf16 %v355_v20, %v351_v18  ;;  %2447 = vmatpush1.bf16.msra.mxu1 %v3217_v19  ;;  %2366 = vmatmul.mubr.msk.f32.gmra.mrb[2].mxu0 %vm55_vm0, %v22_v17  ;;  %v3244_v28 = vpack.c.bf16 %v354_v26, %v350_v25  ;;  %v356_v29 = vld [vmem:[%s4224_s2 + $0x70] sm:$0xff]  ;;  %v359_v31 = vld [vmem:[%s4224_s2 + $0x88] sm:$0xff]  ;;  %v361_v34 = vld [vmem:[%s4224_s2 + $0x98] sm:$0xff] }
   0x9   :  { %v23_v30 = vld [vmem:[%s4223_s0 + $0x10] sm:$0xff]  ;;  %2374 = vmatmul.mubr.msk.f32.gmra.mrb[2].mxu1 %vm55_vm0, %v22_v17  ;;  %v3257_v32 = vpack.c.bf16 %v356_v29, %v352_v27  ;;  %v363_v33 = vld [vmem:[%s4224_s2 + $0xa8] sm:$0xff]  ;;  %v365_v35 = vld [vmem:[%s4224_s2 + $0xb8] sm:$0xff]  ;;  %2449 = vmatprep.subr.bf16.mxu1 %v3231_v24 }
   0xa   :  { %2417 = vmatprep.subr.bf16.mxu0 %v3229_v23  ;;  %156 = vmatprep.mubr.f32.mxu0 %v3117_v3  ;;  %v3270_v36 = vpack.c.bf16 %v363_v33, %v359_v31  ;;  %v3272_v37 = vpack.c.bf16 %v365_v35, %v361_v34  ;;  %v358_v38 = vld [vmem:[%s4224_s2 + $0x80] sm:$0xff]  ;;  %v360_v40 = vld [vmem:[%s4224_s2 + $0x90] sm:$0xff]  ;;  %v24_v43 = vld [vmem:[%s4223_s0 + $0x18] sm:$0xff] }
   0xb   :  { %v362_v39 = vld [vmem:[%s4224_s2 + $0xa0] sm:$0xff]  ;;  %2419 = vmatpush1.bf16.msra.mxu0 %v3244_v28  ;;  %269 = vmatprep.mubr.f32.mxu1 %v3117_v3  ;;  %v364_v42 = vld [vmem:[%s4224_s2 + $0xb0] sm:$0xff]  ;;  %v367_v44 = vld [vmem:[%s4224_s2 + $0xc8] sm:$0xff] }
   0xc   :  { %v3285_v41 = vpack.c.bf16 %v362_v39, %v358_v38  ;;  %2451 = vmatpush1.bf16.msra.mxu1 %v3257_v32  ;;  %2367 = vmatmul.mubr.msk.f32.gmra.mrb[4].mxu0 %vm55_vm0, %v23_v30  ;;  %v3298_v45 = vpack.c.bf16 %v364_v42, %v360_v40  ;;  %v371_v46 = vld [vmem:[%s4224_s2 + $0xe8] sm:$0xff]  ;;  %v369_v47 = vld [vmem:[%s4224_s2 + $0xd8] sm:$0xff]  ;;  %v366_v50 = vld [vmem:[%s4224_s2 + $0xc0] sm:$0xff] }
   0xd   :  { %v373_v48 = vld [vmem:[%s4224_s2 + $0xf8] sm:$0xff]  ;;  %2375 = vmatmul.mubr.msk.f32.gmra.mrb[4].mxu1 %vm55_vm0, %v23_v30  ;;  %2421 = vmatprep.subr.bf16.mxu0 %v3270_v36  ;;  %v3311_v49 = vpack.c.bf16 %v371_v46, %v367_v44  ;;  %v370_v51 = vld [vmem:[%s4224_s2 + $0xe0] sm:$0xff]  ;;  %v368_v52 = vld [vmem:[%s4224_s2 + $0xd0] sm:$0xff] }
   0xe   :  { %2453 = vmatprep.subr.bf16.mxu1 %v3272_v37  ;;  %162 = vmatprep.mubr.f32.mxu0 %v3117_v3  ;;  %v3324_v53 = vpack.c.bf16 %v373_v48, %v369_v47  ;;  %v372_v54 = vld [vmem:[%s4224_s2 + $0xf0] sm:$0xff]  ;;  %v375_v55 = vld [vmem:[%s4224_s2 + $0x108] sm:$0xff]  ;;  %v3334_v56 = vpack.c.bf16 %v370_v51, %v366_v50  ;;  %v377_v58 = vld [vmem:[%s4224_s2 + $0x118] sm:$0xff] }
   0xf   :  { %2423 = vmatpush1.bf16.msra.mxu0 %v3285_v41  ;;  %275 = vmatprep.mubr.f32.mxu1 %v3117_v3  ;;  %v379_v57 = vld [vmem:[%s4224_s2 + $0x128] sm:$0xff]  ;;  %v381_v59 = vld [vmem:[%s4224_s2 + $0x138] sm:$0xff]  ;;  %v3347_v60 = vpack.c.bf16 %v372_v54, %v368_v52  ;;  %v374_v61 = vld [vmem:[%s4224_s2 + $0x100] sm:$0xff] }
  0x10   :  { %2455 = vmatpush1.bf16.msra.mxu1 %v3298_v45  ;;  %2368 = vmatmul.mubr.msk.f32.gmra.mrb[6].mxu0 %vm55_vm0, %v24_v43  ;;  %v378_v62 = vld [vmem:[%s4224_s2 + $0x120] sm:$0xff]  ;;  %v3360_v0 = vpack.c.bf16 %v379_v57, %v375_v55  ;;  %v376_v1 = vld [vmem:[%s4224_s2 + $0x110] sm:$0xff]  ;;  %v3370_v4 = vpack.c.bf16 %v381_v59, %v377_v58  ;;  %v383_v5 = vld [vmem:[%s4224_s2 + $0x148] sm:$0xff] }
  0x11   :  { %2376 = vmatmul.mubr.msk.f32.gmra.mrb[6].mxu1 %vm55_vm0, %v24_v43  ;;  %2425 = vmatprep.subr.bf16.mxu0 %v3311_v49  ;;  %v25_v63 = vld [vmem:[%s4223_s0 + $0x20] sm:$0xff]  ;;  %v380_v2 = vld [vmem:[%s4224_s2 + $0x130] sm:$0xff]  ;;  %v387_v6 = vld [vmem:[%s4224_s2 + $0x168] sm:$0xff]  ;;  %v3380_v7 = vpack.c.bf16 %v378_v62, %v374_v61  ;;  %v35_v62 = vlaneseq }
  0x12   :  { %2457 = vmatprep.subr.bf16.mxu1 %v3324_v53  ;;  %168 = vmatprep.mubr.f32.mxu0 %v3117_v3  ;;  %v385_v8 = vld [vmem:[%s4224_s2 + $0x158] sm:$0xff]  ;;  %v3390_v12 = vpack.c.bf16 %v380_v2, %v376_v1  ;;  %v382_v13 = vld [vmem:[%s4224_s2 + $0x140] sm:$0xff]  ;;  %v26_v16 = vld [vmem:[%s4223_s0 + $0x28] sm:$0xff]  ;;  %v3403_v17 = vpack.c.bf16 %v387_v6, %v383_v5 }
  0x13   :  { %2427 = vmatpush1.bf16.msra.mxu0 %v3334_v56  ;;  %281 = vmatprep.mubr.f32.mxu1 %v3117_v3  ;;  %v389_v9 = vld [vmem:[%s4224_s2 + $0x178] sm:$0xff]  ;;  %v386_v14 = vld [vmem:[%s4224_s2 + $0x160] sm:$0xff]  ;;  %v384_v18 = vld [vmem:[%s4224_s2 + $0x150] sm:$0xff] }
  0x14   :  { %2459 = vmatpush1.bf16.msra.mxu1 %v3347_v60  ;;  %2369 = vmatmul.mubr.msk.f32.gmra.mrb[8].mxu0 %vm55_vm0, %v25_v63  ;;  %v388_v20 = vld [vmem:[%s4224_s2 + $0x170] sm:$0xff]  ;;  %v3413_v21 = vpack.c.bf16 %v389_v9, %v385_v8  ;;  %v391_v22 = vld [vmem:[%s4224_s2 + $0x188] sm:$0xff]  ;;  %v3423_v26 = vpack.c.bf16 %v386_v14, %v382_v13  ;;  %v393_v27 = vld [vmem:[%s4224_s2 + $0x198] sm:$0xff] }
  0x15   :  { %2377 = vmatmul.mubr.msk.f32.gmra.mrb[8].mxu1 %vm55_vm0, %v25_v63  ;;  %2429 = vmatprep.subr.bf16.mxu0 %v3360_v0  ;;  %v395_v25 = vld [vmem:[%s4224_s2 + $0x1a8] sm:$0xff]  ;;  %v397_v29 = vld [vmem:[%s4224_s2 + $0x1b8] sm:$0xff]  ;;  %v3433_v30 = vpack.c.bf16 %v388_v20, %v384_v18  ;;  %v390_v31 = vld [vmem:[%s4224_s2 + $0x180] sm:$0xff]  ;;  %v3555_v63 = vshrl.u32 %v35_v62, 7 }
  0x16   :  { %2461 = vmatprep.subr.bf16.mxu1 %v3370_v4  ;;  %174 = vmatprep.mubr.f32.mxu0 %v3117_v3  ;;  %v394_v33 = vld [vmem:[%s4224_s2 + $0x1a0] sm:$0xff]  ;;  %v27_v34 = vld [vmem:[%s4223_s0 + $0x30] sm:$0xff]  ;;  %v3446_v35 = vpack.c.bf16 %v395_v25, %v391_v22  ;;  %v3456_v40 = vpack.c.bf16 %v397_v29, %v393_v27  ;;  %v399_v42 = vld [vmem:[%s4224_s2 + $0x1c8] sm:$0xff] }
  0x17   :  { %2431 = vmatpush1.bf16.msra.mxu0 %v3380_v7  ;;  %287 = vmatprep.mubr.f32.mxu1 %v3117_v3  ;;  %v392_v38 = vld [vmem:[%s4224_s2 + $0x190] sm:$0xff]  ;;  %v403_v43 = vld [vmem:[%s4224_s2 + $0x1e8] sm:$0xff]  ;;  %v3466_v44 = vpack.c.bf16 %v394_v33, %v390_v31  ;;  %v401_v46 = vld [vmem:[%s4224_s2 + $0x1d8] sm:$0xff]  ;;  %v37_v1 = vsub.s32 0, %v3555_v63  ;;  %v41_v5 = vsub.s32 1, %v3555_v63  ;;  %v45_v27 = vsub.s32 2, %v3555_v63 }
  0x18   :  { %2463 = vmatpush1.bf16.msra.mxu1 %v3390_v12  ;;  %2370 = vmatmul.mubr.msk.f32.gmra.mrb[10].mxu0 %vm55_vm0, %v26_v16  ;;  %v396_v39 = vld [vmem:[%s4224_s2 + $0x1b0] sm:$0xff]  ;;  %v405_v47 = vld [vmem:[%s4224_s2 + $0x1f8] sm:$0xff]  ;;  %v398_v50 = vld [vmem:[%s4224_s2 + $0x1c0] sm:$0xff]  ;;  %v3489_v54 = vpack.c.bf16 %v403_v43, %v399_v42 }
  0x19   :  { %2378 = vmatmul.mubr.msk.f32.gmra.mrb[10].mxu1 %vm55_vm0, %v26_v16  ;;  %2433 = vmatprep.subr.bf16.mxu0 %v3403_v17  ;;  %v3476_v48 = vpack.c.bf16 %v396_v39, %v392_v38  ;;  %v402_v51 = vld [vmem:[%s4224_s2 + $0x1e0] sm:$0xff]  ;;  %v28_v52 = vld [vmem:[%s4223_s0 + $0x38] sm:$0xff]  ;;  %v400_v55 = vld [vmem:[%s4224_s2 + $0x1d0] sm:$0xff]  ;;  %v3499_v58 = vpack.c.bf16 %v405_v47, %v401_v46 }
  0x1a   :  { %2465 = vmatprep.subr.bf16.mxu1 %v3413_v21  ;;  %180 = vmatprep.mubr.f32.mxu0 %v3117_v3  ;;  %v404_v57 = vld [vmem:[%s4224_s2 + $0x1f0] sm:$0xff]  ;;  %v3503_v59 = vpack.c.bf16 %v402_v51, %v398_v50  ;;  %v33_v2 = vld [vmem:[%s4225_s3] sm:$0xf] }
  0x1b   :  { %2435 = vmatpush1.bf16.msra.mxu0 %v3423_v26  ;;  %293 = vmatprep.mubr.f32.mxu1 %v3117_v3  ;;  %v3507_v61 = vpack.c.bf16 %v404_v57, %v400_v55  ;;  %v3562_v6 = vrot.slane %v33_v2, %v37_v1  ;;  %v3564_v8 = vrot.slane %v33_v2, %v41_v5 }
  0x1c   :  { %2467 = vmatpush1.bf16.msra.mxu1 %v3433_v30  ;;  %2371 = vmatmul.mubr.msk.f32.gmra.mrb[12].mxu0 %vm55_vm0, %v27_v34  ;;  %v3573_v31 = vrot.slane %v33_v2, %v45_v27 }
  0x1d   :  { %2379 = vmatmul.mubr.msk.f32.gmra.mrb[12].mxu1 %vm55_vm0, %v27_v34  ;;  %2437 = vmatprep.subr.bf16.mxu0 %v3446_v35 }
  0x1e   :  { %2469 = vmatprep.subr.bf16.mxu1 %v3456_v40  ;;  %186 = vmatprep.mubr.f32.mxu0 %v3117_v3 }
  0x1f   :  { %2439 = vmatpush1.bf16.msra.mxu0 %v3466_v44  ;;  %299 = vmatprep.mubr.f32.mxu1 %v3117_v3 }
  0x20   :  { %2471 = vmatpush1.bf16.msra.mxu1 %v3476_v48  ;;  %2372 = vmatmul.mubr.msk.f32.gmra.mrb[14].mxu0 %vm55_vm0, %v28_v52 }
  0x21   :  { %2380 = vmatmul.mubr.msk.f32.gmra.mrb[14].mxu1 %vm55_vm0, %v28_v52  ;;  %2441 = vmatprep.subr.bf16.mxu0 %v3489_v54 }
  0x22   :  { %2473 = vmatprep.subr.bf16.mxu1 %v3499_v58  ;;  %470 = vmatprep.mubr.f32.mxu0 %v3117_v3 }
  0x23   :  { %2443 = vmatpush1.bf16.msra.mxu0 %v3503_v59  ;;  %541 = vmatprep.mubr.f32.mxu1 %v3117_v3 }
  0x24   :  { %2475 = vmatpush1.bf16.msra.mxu1 %v3507_v61  ;;  %2477 = vmatprep.subr.bf16.mxu0 %v3189_v10 }
  0x25   :  { %2509 = vmatprep.subr.bf16.mxu1 %v3191_v11 }
  0x26   :  { %471 = vmatmul.mubr.f32.vlgmr.msra.gmra.mrb[0].mxu0 %v3117_v3 }
  0x27   :  { %542 = vmatmul.mubr.f32.vlgmr.msra.gmra.mrb[0].mxu1 %v3117_v3  ;;  %2479 = vmatpush1.bf16.msra.mxu0 %v3202_v15 }
  0x28   :  { %2511 = vmatpush1.bf16.msra.mxu1 %v3217_v19  ;;  %2481 = vmatprep.subr.bf16.mxu0 %v3229_v23 }
  0x29   :  { %2513 = vmatprep.subr.bf16.mxu1 %v3231_v24  ;;  %709 = vmatprep.mubr.f32.mxu0 %v3117_v3 }
  0x2a   :  { %780 = vmatprep.mubr.f32.mxu1 %v3117_v3 }
  0x2b   :  { %2483 = vmatpush1.bf16.msra.mxu0 %v3244_v28 }
  0x2c   :  { %2515 = vmatpush1.bf16.msra.mxu1 %v3257_v32  ;;  %2485 = vmatprep.subr.bf16.mxu0 %v3270_v36 }
  0x2d   :  { %2517 = vmatprep.subr.bf16.mxu1 %v3272_v37 }
  0x2f   :  { %2487 = vmatpush1.bf16.msra.mxu0 %v3285_v41 }
  0x30   :  { %2519 = vmatpush1.bf16.msra.mxu1 %v3298_v45  ;;  %2489 = vmatprep.subr.bf16.mxu0 %v3311_v49 }
  0x31   :  { %2521 = vmatprep.subr.bf16.mxu1 %v3324_v53 }
  0x33   :  { %2491 = vmatpush1.bf16.msra.mxu0 %v3334_v56 }
  0x34   :  { %2523 = vmatpush1.bf16.msra.mxu1 %v3347_v60  ;;  %2493 = vmatprep.subr.bf16.mxu0 %v3360_v0 }
  0x35   :  { %2525 = vmatprep.subr.bf16.mxu1 %v3370_v4 }
  0x37   :  { %2495 = vmatpush1.bf16.msra.mxu0 %v3380_v7 }
  0x38   :  { %2527 = vmatpush1.bf16.msra.mxu1 %v3390_v12  ;;  %2497 = vmatprep.subr.bf16.mxu0 %v3403_v17 }
  0x39   :  { %2529 = vmatprep.subr.bf16.mxu1 %v3413_v21 }
  0x3b   :  { %2499 = vmatpush1.bf16.msra.mxu0 %v3423_v26 }
  0x3c   :  { %2531 = vmatpush1.bf16.msra.mxu1 %v3433_v30  ;;  %2501 = vmatprep.subr.bf16.mxu0 %v3446_v35 }
  0x3d   :  { %2533 = vmatprep.subr.bf16.mxu1 %v3456_v40 }
  0x3f   :  { %2503 = vmatpush1.bf16.msra.mxu0 %v3466_v44 }
  0x40   :  { %2535 = vmatpush1.bf16.msra.mxu1 %v3476_v48  ;;  %2505 = vmatprep.subr.bf16.mxu0 %v3489_v54 }
  0x41   :  { %2537 = vmatprep.subr.bf16.mxu1 %v3499_v58 }
  0x43   :  { %2507 = vmatpush1.bf16.msra.mxu0 %v3503_v59 }
  0x44   :  { %2539 = vmatpush1.bf16.msra.mxu1 %v3507_v61  ;;  %2541 = vmatprep.subr.bf16.mxu0 %v3189_v10  ;;  %v49_v10 = vsub.s32 3, %v3555_v63 }
  0x45   :  { %2573 = vmatprep.subr.bf16.mxu1 %v3191_v11 }
  0x46   :  { %v3569_v25 = vrot.slane %v33_v2, %v49_v10 }
  0xf9   :  { %v472_v9 = vpop.f32.mrb[0].mxu0 }
  0xfa   :  { %v2924_v11 = vadd.f32 %v472_v9, %v3562_v6  ;;  %v543_v13 = vpop.f32.mrb[0].mxu1  ;;  %v474_v14 = vpop.f32.mrb[1].mxu0 }
  0xfb   :  { %v2925_v16 = vadd.f32 %v474_v14, %v3564_v8  ;;  %v545_v18 = vpop.f32.mrb[1].mxu1  ;;  %v2940_v34 = vadd.f32 %v543_v13, %v3573_v31 }
  0xfc   :  { %v2381_v20 = vmul.f32 -1.442695, %v2924_v11  ;;  %v2941_v29 = vadd.f32 %v545_v18, %v3569_v25 }
  0xfd   :  { %v2382_v22 = vmul.f32 -1.442695, %v2925_v16 }
  0xfe   :  { %2989 = vpow2.f32 %v2381_v20  ;;  %v2383_v33 = vmul.f32 -1.442695, %v2941_v29 }
  0xff   :  { %2991 = vpow2.f32 %v2382_v22 }
 0x100   :  { %2993 = vpow2.f32 %v2383_v33  ;;  %v1062_v33 = vld [vmem:[%s4224_s2 + $0x8] sm:$0xff] }
 0x101   :  { %2995 = vtanh.f32 %v2940_v34  ;;  %v1066_v34 = vld [vmem:[%s4224_s2 + $0x28] sm:$0xff] }
 0x108   :  { %v2990_v38 = vpop.eup %2989 }
 0x109   :  { %v2992_v39 = vpop.eup %2991  ;;  %v555_v42 = vadd.f32 1.0, %v2990_v38  ;;  %v1064_v38 = vld [vmem:[%s4224_s2 + $0x18] sm:$0xff] }
 0x10a   :  { %v561_v43 = vadd.f32 1.0, %v2992_v39  ;;  %v2994_v46 = vpop.eup %2993  ;;  %v3636_v39 = vpack.c.bf16 %v1066_v34, %v1062_v33  ;;  %v1087_v34 = vld [vmem:[%s4224_s2 + $0xd0] sm:$0xff] }
 0x10b   :  { %2997 = vrcp.f32 %v555_v42  ;;  %v2996_v47 = vpop.eup %2995  ;;  %v568_v55 = vadd.f32 1.0, %v2994_v46  ;;  %v1068_v42 = vld [vmem:[%s4224_s2 + $0x38] sm:$0xff]  ;;  %v1065_v46 = vld [vmem:[%s4224_s2 + $0x20] sm:$0xff] }
 0x10c   :  { %2999 = vrcp.f32 %v561_v43  ;;  %v1061_v43 = vld [vmem:[%s4224_s2] sm:$0xff] }
 0x10d   :  { %3001 = vrcp.f32 %v568_v55 }
 0x115   :  { %v2998_v50 = vpop.eup %2997 }
 0x116   :  { %v3000_v51 = vpop.eup %2999  ;;  %v572_v52 = vmul.f32 %v2998_v50, %v2996_v47  ;;  %v3647_v47 = vpack.c.bf16 %v1068_v42, %v1064_v38  ;;  %v3649_v50 = vpack.c.bf16 %v1065_v46, %v1061_v43  ;;  %v1091_v38 = vld [vmem:[%s4224_s2 + $0xf0] sm:$0xff]  ;;  %v1094_v43 = vld [vmem:[%s4224_s2 + $0x108] sm:$0xff] }
 0x117   :  { %v571_v57 = vmul.f32 0.0, %v3000_v51  ;;  %v3002_v2 = vpop.eup %3001  ;;  %v1063_v51 = vld [vmem:[%s4224_s2 + $0x10] sm:$0xff]  ;;  %v3766_v42 = vpack.c.bf16 %v1091_v38, %v1087_v34  ;;  %v1098_v46 = vld [vmem:[%s4224_s2 + $0x128] sm:$0xff] }
 0x118   :  { %v1346_v38 = vld [vmem:[%s4224_s2 + $0x168] sm:$0xff] }
 0x119   :  { %v3576_v1 = vadd.f32 %v572_v52, %v571_v57  ;;  %v1067_v52 = vld [vmem:[%s4224_s2 + $0x30] sm:$0xff]  ;;  %v1070_v57 = vld [vmem:[%s4224_s2 + $0x48] sm:$0xff] }
 0x11a   :  { %v3658_v55 = vpack.c.bf16 %v1067_v52, %v1063_v51  ;;  %v1096_v51 = vld [vmem:[%s4224_s2 + $0x118] sm:$0xff]  ;;  %v3780_v52 = vpack.c.bf16 %v1098_v46, %v1094_v43 }
 0x11b   :  { %3003 = vtanh.f32 %v3576_v1  ;;  %v1344_v43 = vld [vmem:[%s4224_s2 + $0x158] sm:$0xff] }
 0x125   :  { %v3004_v5 = vpop.eup %3003 }
 0x126   :  { %v575_v9 = vmul.f32 %v3004_v5, %v3002_v2  ;;  %v1072_v2 = vld [vmem:[%s4224_s2 + $0x58] sm:$0xff] }
 0x128   :  { %576 = vst [vmem:[%s4226_s4] sm:$0xff] %v575_v9  ;;  %710 = vmatmul.mubr.f32.vlgmr.msra.gmra.mrb[2].mxu0 %v575_v9  ;;  %781 = vmatmul.mubr.f32.vlgmr.msra.gmra.mrb[2].mxu1 %v575_v9  ;;  %v2267_v10 = vmax.f32 %v575_v9, 0.0  ;;  %v1076_v9 = vld [vmem:[%s4224_s2 + $0x78] sm:$0xff] }
 0x129   :  { %2543 = vmatpush1.bf16.msra.mxu0 %v3202_v15  ;;  %2575 = vmatpush1.bf16.msra.mxu1 %v3217_v19 }
 0x12a   :  { %2275 = vadd.xlane.f32.xlu0 %v2267_v10  ;;  %2545 = vmatprep.subr.bf16.mxu0 %v3229_v23  ;;  %v1069_v10 = vld [vmem:[%s4224_s2 + $0x40] sm:$0xff] }
 0x12b   :  { %2577 = vmatprep.subr.bf16.mxu1 %v3231_v24  ;;  %949 = vmatprep.mubr.f32.mxu0 %v3117_v3 }
 0x12c   :  { %1020 = vmatprep.mubr.f32.mxu1 %v3117_v3 }
 0x12d   :  { %2547 = vmatpush1.bf16.msra.mxu0 %v3244_v28  ;;  %2579 = vmatpush1.bf16.msra.mxu1 %v3257_v32 }
 0x12e   :  { %2549 = vmatprep.subr.bf16.mxu0 %v3270_v36  ;;  %2581 = vmatprep.subr.bf16.mxu1 %v3272_v37 }
 0x131   :  { %2551 = vmatpush1.bf16.msra.mxu0 %v3285_v41  ;;  %2583 = vmatpush1.bf16.msra.mxu1 %v3298_v45 }
 0x132   :  { %2553 = vmatprep.subr.bf16.mxu0 %v3311_v49  ;;  %2585 = vmatprep.subr.bf16.mxu1 %v3324_v53 }
 0x135   :  { %2555 = vmatpush1.bf16.msra.mxu0 %v3334_v56  ;;  %2587 = vmatpush1.bf16.msra.mxu1 %v3347_v60 }
 0x136   :  { %2557 = vmatprep.subr.bf16.mxu0 %v3360_v0  ;;  %2589 = vmatprep.subr.bf16.mxu1 %v3370_v4 }
 0x139   :  { %2559 = vmatpush1.bf16.msra.mxu0 %v3380_v7  ;;  %2591 = vmatpush1.bf16.msra.mxu1 %v3390_v12 }
 0x13a   :  { %2561 = vmatprep.subr.bf16.mxu0 %v3403_v17  ;;  %2593 = vmatprep.subr.bf16.mxu1 %v3413_v21 }
 0x13d   :  { %2563 = vmatpush1.bf16.msra.mxu0 %v3423_v26  ;;  %2595 = vmatpush1.bf16.msra.mxu1 %v3433_v30 }
 0x13e   :  { %2565 = vmatprep.subr.bf16.mxu0 %v3446_v35  ;;  %2597 = vmatprep.subr.bf16.mxu1 %v3456_v40 }
 0x141   :  { %2567 = vmatpush1.bf16.msra.mxu0 %v3466_v44  ;;  %2599 = vmatpush1.bf16.msra.mxu1 %v3476_v48 }
 0x142   :  { %2569 = vmatprep.subr.bf16.mxu0 %v3489_v54  ;;  %2601 = vmatprep.subr.bf16.mxu1 %v3499_v58 }
 0x145   :  { %2571 = vmatpush1.bf16.msra.mxu0 %v3503_v59  ;;  %2603 = vmatpush1.bf16.msra.mxu1 %v3507_v61 }
 0x146   :  { %2605 = vmatprep.subr.bf16.mxu0 %v3636_v39  ;;  %2637 = vmatprep.subr.bf16.mxu1 %v3647_v47 }
 0x1fb   :  { %v711_v15 = vpop.f32.mrb[2].mxu0  ;;  %v782_v19 = vpop.f32.mrb[2].mxu1 }
 0x1fc   :  { %v2926_v23 = vadd.f32 %v711_v15, %v3562_v6  ;;  %v713_v24 = vpop.f32.mrb[3].mxu0  ;;  %v784_v28 = vpop.f32.mrb[3].mxu1  ;;  %v2942_v49 = vadd.f32 %v782_v19, %v3573_v31  ;;  %v1073_v15 = vld [vmem:[%s4224_s2 + $0x60] sm:$0xff]  ;;  %v3683_v19 = vpack.c.bf16 %v1076_v9, %v1072_v2 }
 0x1fd   :  { %v2927_v32 = vadd.f32 %v713_v24, %v3564_v8  ;;  %v2943_v41 = vadd.f32 %v784_v28, %v3569_v25  ;;  %v1071_v24 = vld [vmem:[%s4224_s2 + $0x50] sm:$0xff]  ;;  %v1097_v2 = vld [vmem:[%s4224_s2 + $0x120] sm:$0xff] }
 0x1fe   :  { %v2384_v36 = vmul.f32 -1.442695, %v2926_v23  ;;  %v3685_v23 = vpack.c.bf16 %v1073_v15, %v1069_v10  ;;  %v1075_v28 = vld [vmem:[%s4224_s2 + $0x70] sm:$0xff] }
 0x1ff   :  { %v2385_v37 = vmul.f32 -1.442695, %v2927_v32  ;;  %v2386_v45 = vmul.f32 -1.442695, %v2943_v41  ;;  %v3694_v32 = vpack.c.bf16 %v1075_v28, %v1071_v24  ;;  %v1080_v41 = vld [vmem:[%s4224_s2 + $0x98] sm:$0xff]  ;;  %v1095_v15 = vld [vmem:[%s4224_s2 + $0x110] sm:$0xff] }
 0x200   :  { %3005 = vpow2.f32 %v2384_v36  ;;  %v1078_v36 = vld [vmem:[%s4224_s2 + $0x88] sm:$0xff]  ;;  %v1099_v24 = vld [vmem:[%s4224_s2 + $0x130] sm:$0xff] }
 0x201   :  { %3007 = vpow2.f32 %v2385_v37  ;;  %v1082_v37 = vld [vmem:[%s4224_s2 + $0xa8] sm:$0xff]  ;;  %v3802_v28 = vpack.c.bf16 %v1099_v24, %v1095_v15  ;;  %v1343_v24 = vld [vmem:[%s4224_s2 + $0x150] sm:$0xff] }
 0x202   :  { %3009 = vpow2.f32 %v2386_v45  ;;  %v3708_v45 = vpack.c.bf16 %v1082_v37, %v1078_v36 }
 0x203   :  { %3011 = vtanh.f32 %v2942_v49  ;;  %v1084_v49 = vld [vmem:[%s4224_s2 + $0xb8] sm:$0xff] }
 0x20a   :  { %v3006_v53 = vpop.eup %3005 }
 0x20b   :  { %v3008_v56 = vpop.eup %3007  ;;  %v794_v60 = vadd.f32 1.0, %v3006_v53  ;;  %v1077_v53 = vld [vmem:[%s4224_s2 + $0x80] sm:$0xff] }
 0x20c   :  { %v800_v0 = vadd.f32 1.0, %v3008_v56  ;;  %v3010_v4 = vpop.eup %3009  ;;  %v1081_v56 = vld [vmem:[%s4224_s2 + $0xa0] sm:$0xff] }
 0x20d   :  { %3013 = vrcp.f32 %v794_v60  ;;  %v3012_v7 = vpop.eup %3011  ;;  %v807_v14 = vadd.f32 1.0, %v3010_v4  ;;  %v3719_v60 = vpack.c.bf16 %v1084_v49, %v1080_v41  ;;  %v1079_v4 = vld [vmem:[%s4224_s2 + $0x90] sm:$0xff] }
 0x20e   :  { %3015 = vrcp.f32 %v800_v0  ;;  %v3721_v0 = vpack.c.bf16 %v1081_v56, %v1077_v53 }
 0x20f   :  { %3017 = vrcp.f32 %v807_v14  ;;  %v1088_v14 = vld [vmem:[%s4224_s2 + $0xd8] sm:$0xff] }
 0x217   :  { %v3014_v12 = vpop.eup %3013 }
 0x218   :  { %v3016_v11 = vpop.eup %3015  ;;  %v811_v13 = vmul.f32 %v3014_v12, %v3012_v7  ;;  %v1083_v7 = vld [vmem:[%s4224_s2 + $0xb0] sm:$0xff] }
 0x219   :  { %v810_v16 = vmul.f32 %v3016_v11, %v3576_v1  ;;  %v3018_v20 = vpop.eup %3017  ;;  %v1074_v1 = vld [vmem:[%s4224_s2 + $0x68] sm:$0xff]  ;;  %v3730_v12 = vpack.c.bf16 %v1083_v7, %v1079_v4 }
 0x21a   :  { %v3672_v5 = vpack.c.bf16 %v1074_v1, %v1070_v57  ;;  %v1086_v11 = vld [vmem:[%s4224_s2 + $0xc8] sm:$0xff]  ;;  %v1100_v57 = vld [vmem:[%s4224_s2 + $0x138] sm:$0xff]  ;;  %v1093_v1 = vld [vmem:[%s4224_s2 + $0x100] sm:$0xff] }
 0x21b   :  { %v3619_v18 = vadd.f32 %v811_v13, %v810_v16  ;;  %v1090_v13 = vld [vmem:[%s4224_s2 + $0xe8] sm:$0xff]  ;;  %v3791_v9 = vpack.c.bf16 %v1100_v57, %v1096_v51  ;;  %v3793_v10 = vpack.c.bf16 %v1097_v2, %v1093_v1  ;;  %v1348_v51 = vld [vmem:[%s4224_s2 + $0x178] sm:$0xff]  ;;  %v1341_v57 = vld [vmem:[%s4224_s2 + $0x140] sm:$0xff] }
 0x21c   :  { %v3744_v16 = vpack.c.bf16 %v1090_v13, %v1086_v11  ;;  %v1345_v1 = vld [vmem:[%s4224_s2 + $0x160] sm:$0xff]  ;;  %v3872_v2 = vpack.c.bf16 %v1348_v51, %v1344_v43 }
 0x21d   :  { %3019 = vtanh.f32 %v3619_v18  ;;  %v3874_v15 = vpack.c.bf16 %v1345_v1, %v1341_v57 }
 0x227   :  { %v3020_v22 = vpop.eup %3019 }
 0x228   :  { %v814_v27 = vmul.f32 %v3020_v22, %v3018_v20  ;;  %v1092_v20 = vld [vmem:[%s4224_s2 + $0xf8] sm:$0xff]  ;;  %v1085_v22 = vld [vmem:[%s4224_s2 + $0xc0] sm:$0xff] }
 0x22a   :  { %2387 = vst [vmem:[%s4226_s4 + $0x8] sm:$0xff] %v814_v27  ;;  %950 = vmatmul.mubr.f32.vlgmr.msra.gmra.mrb[4].mxu0 %v814_v27  ;;  %1021 = vmatmul.mubr.f32.vlgmr.msra.gmra.mrb[4].mxu1 %v814_v27  ;;  %v2268_v29 = vmax.f32 %v814_v27, 0.0  ;;  %v1089_v27 = vld [vmem:[%s4224_s2 + $0xe0] sm:$0xff] }
 0x22b   :  { %1189 = vmatprep.mubr.f32.mxu0 %v3117_v3  ;;  %1260 = vmatprep.mubr.f32.mxu1 %v3117_v3  ;;  %v3757_v33 = vpack.c.bf16 %v1089_v27, %v1085_v22 }
 0x22c   :  { %2277 = vadd.xlane.f32.xlu0 %v2268_v29  ;;  %2607 = vmatpush1.bf16.msra.mxu0 %v3649_v50  ;;  %v3755_v29 = vpack.c.bf16 %v1092_v20, %v1088_v14 }
 0x22d   :  { %2639 = vmatpush1.bf16.msra.mxu1 %v3658_v55  ;;  %2609 = vmatprep.subr.bf16.mxu0 %v3672_v5 }
 0x22e   :  { %2641 = vmatprep.subr.bf16.mxu1 %v3683_v19 }
 0x230   :  { %2611 = vmatpush1.bf16.msra.mxu0 %v3685_v23 }
 0x231   :  { %2643 = vmatpush1.bf16.msra.mxu1 %v3694_v32  ;;  %2613 = vmatprep.subr.bf16.mxu0 %v3708_v45 }
 0x232   :  { %2645 = vmatprep.subr.bf16.mxu1 %v3719_v60 }
 0x234   :  { %2615 = vmatpush1.bf16.msra.mxu0 %v3721_v0 }
 0x235   :  { %2647 = vmatpush1.bf16.msra.mxu1 %v3730_v12  ;;  %2617 = vmatprep.subr.bf16.mxu0 %v3744_v16 }
 0x236   :  { %2649 = vmatprep.subr.bf16.mxu1 %v3755_v29 }
 0x238   :  { %2619 = vmatpush1.bf16.msra.mxu0 %v3757_v33 }
 0x239   :  { %2651 = vmatpush1.bf16.msra.mxu1 %v3766_v42  ;;  %2621 = vmatprep.subr.bf16.mxu0 %v3780_v52 }
 0x23a   :  { %2653 = vmatprep.subr.bf16.mxu1 %v3791_v9 }
 0x23c   :  { %2623 = vmatpush1.bf16.msra.mxu0 %v3793_v10 }
 0x23d   :  { %2655 = vmatpush1.bf16.msra.mxu1 %v3802_v28  ;;  %2625 = vmatprep.subr.bf16.mxu0 %v3403_v17 }
 0x23e   :  { %2657 = vmatprep.subr.bf16.mxu1 %v3413_v21 }
 0x240   :  { %2627 = vmatpush1.bf16.msra.mxu0 %v3423_v26 }
 0x241   :  { %2659 = vmatpush1.bf16.msra.mxu1 %v3433_v30  ;;  %2629 = vmatprep.subr.bf16.mxu0 %v3446_v35 }
 0x242   :  { %2661 = vmatprep.subr.bf16.mxu1 %v3456_v40 }
 0x244   :  { %2631 = vmatpush1.bf16.msra.mxu0 %v3466_v44 }
 0x245   :  { %2663 = vmatpush1.bf16.msra.mxu1 %v3476_v48  ;;  %2633 = vmatprep.subr.bf16.mxu0 %v3489_v54 }
 0x246   :  { %2665 = vmatprep.subr.bf16.mxu1 %v3499_v58 }
 0x248   :  { %2635 = vmatpush1.bf16.msra.mxu0 %v3503_v59 }
 0x249   :  { %2667 = vmatpush1.bf16.msra.mxu1 %v3507_v61  ;;  %2669 = vmatprep.subr.bf16.mxu0 %v3636_v39 }
 0x24a   :  { %2701 = vmatprep.subr.bf16.mxu1 %v3647_v47 }
 0x2fd   :  { %v951_v17 = vpop.f32.mrb[4].mxu0  ;;  %v1022_v21 = vpop.f32.mrb[4].mxu1 }
 0x2fe   :  { %v2928_v26 = vadd.f32 %v951_v17, %v3562_v6  ;;  %v953_v30 = vpop.f32.mrb[5].mxu0  ;;  %v1024_v35 = vpop.f32.mrb[5].mxu1  ;;  %v2944_v59 = vadd.f32 %v1022_v21, %v3573_v31  ;;  %v1347_v17 = vld [vmem:[%s4224_s2 + $0x170] sm:$0xff]  ;;  %v1350_v21 = vld [vmem:[%s4224_s2 + $0x188] sm:$0xff] }
 0x2ff   :  { %v2929_v40 = vadd.f32 %v953_v30, %v3564_v8  ;;  %v2945_v54 = vadd.f32 %v1024_v35, %v3569_v25  ;;  %v1354_v30 = vld [vmem:[%s4224_s2 + $0x1a8] sm:$0xff]  ;;  %v1352_v35 = vld [vmem:[%s4224_s2 + $0x198] sm:$0xff] }
 0x300   :  { %v2388_v44 = vmul.f32 -1.442695, %v2928_v26  ;;  %v3886_v26 = vpack.c.bf16 %v1347_v17, %v1343_v24 }
 0x301   :  { %v2389_v48 = vmul.f32 -1.442695, %v2929_v40  ;;  %v2390_v58 = vmul.f32 -1.442695, %v2945_v54  ;;  %v1356_v40 = vld [vmem:[%s4224_s2 + $0x1b8] sm:$0xff]  ;;  %v1349_v54 = vld [vmem:[%s4224_s2 + $0x180] sm:$0xff] }
 0x302   :  { %3021 = vpow2.f32 %v2388_v44  ;;  %v3899_v44 = vpack.c.bf16 %v1354_v30, %v1350_v21 }
 0x303   :  { %3023 = vpow2.f32 %v2389_v48  ;;  %v3901_v48 = vpack.c.bf16 %v1356_v40, %v1352_v35 }
 0x304   :  { %3025 = vpow2.f32 %v2390_v58  ;;  %v1353_v58 = vld [vmem:[%s4224_s2 + $0x1a0] sm:$0xff] }
 0x305   :  { %3027 = vtanh.f32 %v2944_v59  ;;  %v1351_v59 = vld [vmem:[%s4224_s2 + $0x190] sm:$0xff] }
 0x30c   :  { %v3022_v61 = vpop.eup %3021 }
 0x30d   :  { %v3024_v36 = vpop.eup %3023  ;;  %v1034_v37 = vadd.f32 1.0, %v3022_v61  ;;  %v3913_v61 = vpack.c.bf16 %v1353_v58, %v1349_v54 }
 0x30e   :  { %v1040_v41 = vadd.f32 1.0, %v3024_v36  ;;  %v3026_v49 = vpop.eup %3025  ;;  %v1355_v36 = vld [vmem:[%s4224_s2 + $0x1b0] sm:$0xff] }
 0x30f   :  { %3029 = vrcp.f32 %v1034_v37  ;;  %v3028_v53 = vpop.eup %3027  ;;  %v1047_v11 = vadd.f32 1.0, %v3026_v49  ;;  %v1358_v37 = vld [vmem:[%s4224_s2 + $0x1c8] sm:$0xff]  ;;  %v3926_v49 = vpack.c.bf16 %v1355_v36, %v1351_v59 }
 0x310   :  { %3031 = vrcp.f32 %v1040_v41  ;;  %v1362_v41 = vld [vmem:[%s4224_s2 + $0x1e8] sm:$0xff] }
 0x311   :  { %3033 = vrcp.f32 %v1047_v11 }
 0x319   :  { %v3030_v56 = vpop.eup %3029 }
 0x31a   :  { %v3032_v4 = vpop.eup %3031  ;;  %v1051_v7 = vmul.f32 %v3030_v56, %v3028_v53  ;;  %v3928_v53 = vpack.c.bf16 %v1362_v41, %v1358_v37  ;;  %v1360_v56 = vld [vmem:[%s4224_s2 + $0x1d8] sm:$0xff] }
 0x31b   :  { %v1050_v13 = vmul.f32 %v3032_v4, %v3619_v18  ;;  %v3034_v20 = vpop.eup %3033  ;;  %v1342_v18 = vld [vmem:[%s4224_s2 + $0x148] sm:$0xff]  ;;  %v1364_v4 = vld [vmem:[%s4224_s2 + $0x1f8] sm:$0xff] }
 0x31c   :  { %v3861_v46 = vpack.c.bf16 %v1346_v38, %v1342_v18  ;;  %v3939_v11 = vpack.c.bf16 %v1364_v4, %v1360_v56 }
 0x31d   :  { %v3826_v14 = vadd.f32 %v1051_v7, %v1050_v13  ;;  %v1357_v7 = vld [vmem:[%s4224_s2 + $0x1c0] sm:$0xff] }
 0x31e   :  { %v1361_v13 = vld [vmem:[%s4224_s2 + $0x1e0] sm:$0xff] }
 0x31f   :  { %3035 = vtanh.f32 %v3826_v14 }
 0x329   :  { %v3036_v22 = vpop.eup %3035 }
 0x32a   :  { %v1054_v27 = vmul.f32 %v3036_v22, %v3034_v20  ;;  %v1359_v20 = vld [vmem:[%s4224_s2 + $0x1d0] sm:$0xff] }
 0x32b   :  { %v1363_v22 = vld [vmem:[%s4224_s2 + $0x1f0] sm:$0xff] }
 0x32c   :  { %2391 = vst [vmem:[%s4226_s4 + $0x10] sm:$0xff] %v1054_v27  ;;  %1190 = vmatmul.mubr.f32.vlgmr.msra.gmra.mrb[6].mxu0 %v1054_v27  ;;  %1261 = vmatmul.mubr.f32.vlgmr.msra.gmra.mrb[6].mxu1 %v1054_v27  ;;  %v2269_v34 = vmax.f32 %v1054_v27, 0.0  ;;  %v3951_v27 = vpack.c.bf16 %v1361_v13, %v1357_v7 }
 0x32d   :  { %2671 = vmatpush1.bf16.msra.mxu0 %v3649_v50  ;;  %2703 = vmatpush1.bf16.msra.mxu1 %v3658_v55 }
 0x32e   :  { %2279 = vadd.xlane.f32.xlu1 %v2269_v34  ;;  %2673 = vmatprep.subr.bf16.mxu0 %v3672_v5  ;;  %v3955_v34 = vpack.c.bf16 %v1363_v22, %v1359_v20 }
 0x32f   :  { %2705 = vmatprep.subr.bf16.mxu1 %v3683_v19  ;;  %1429 = vmatprep.mubr.f32.mxu0 %v3117_v3 }
 0x330   :  { %1500 = vmatprep.mubr.f32.mxu1 %v3117_v3 }
 0x331   :  { %2675 = vmatpush1.bf16.msra.mxu0 %v3685_v23  ;;  %2707 = vmatpush1.bf16.msra.mxu1 %v3694_v32 }
 0x332   :  { %2677 = vmatprep.subr.bf16.mxu0 %v3708_v45  ;;  %2709 = vmatprep.subr.bf16.mxu1 %v3719_v60 }
 0x335   :  { %2679 = vmatpush1.bf16.msra.mxu0 %v3721_v0  ;;  %2711 = vmatpush1.bf16.msra.mxu1 %v3730_v12 }
 0x336   :  { %2681 = vmatprep.subr.bf16.mxu0 %v3744_v16  ;;  %2713 = vmatprep.subr.bf16.mxu1 %v3755_v29 }
 0x339   :  { %2683 = vmatpush1.bf16.msra.mxu0 %v3757_v33  ;;  %2715 = vmatpush1.bf16.msra.mxu1 %v3766_v42 }
 0x33a   :  { %2685 = vmatprep.subr.bf16.mxu0 %v3780_v52  ;;  %2717 = vmatprep.subr.bf16.mxu1 %v3791_v9 }
 0x33d   :  { %2687 = vmatpush1.bf16.msra.mxu0 %v3793_v10  ;;  %2719 = vmatpush1.bf16.msra.mxu1 %v3802_v28 }
 0x33e   :  { %2689 = vmatprep.subr.bf16.mxu0 %v3861_v46  ;;  %2721 = vmatprep.subr.bf16.mxu1 %v3872_v2 }
 0x341   :  { %2691 = vmatpush1.bf16.msra.mxu0 %v3874_v15  ;;  %2723 = vmatpush1.bf16.msra.mxu1 %v3886_v26 }
 0x342   :  { %2693 = vmatprep.subr.bf16.mxu0 %v3899_v44  ;;  %2725 = vmatprep.subr.bf16.mxu1 %v3901_v48 }
 0x345   :  { %2695 = vmatpush1.bf16.msra.mxu0 %v3913_v61  ;;  %2727 = vmatpush1.bf16.msra.mxu1 %v3926_v49 }
 0x346   :  { %2697 = vmatprep.subr.bf16.mxu0 %v3928_v53  ;;  %2729 = vmatprep.subr.bf16.mxu1 %v3939_v11 }
 0x349   :  { %2699 = vmatpush1.bf16.msra.mxu0 %v3951_v27  ;;  %2731 = vmatpush1.bf16.msra.mxu1 %v3955_v34 }
 0x34a   :  { %2733 = vmatprep.subr.bf16.mxu0 %v3636_v39  ;;  %2765 = vmatprep.subr.bf16.mxu1 %v3647_v47 }
 0x3ff   :  { %v1191_v18 = vpop.f32.mrb[6].mxu0  ;;  %v1262_v38 = vpop.f32.mrb[6].mxu1 }
 0x400   :  { %v2930_v43 = vadd.f32 %v1191_v18, %v3562_v6  ;;  %v1193_v51 = vpop.f32.mrb[7].mxu0  ;;  %v1264_v57 = vpop.f32.mrb[7].mxu1  ;;  %v2946_v35 = vadd.f32 %v1262_v38, %v3573_v31 }
 0x401   :  { %v2931_v1 = vadd.f32 %v1193_v51, %v3564_v8  ;;  %v2947_v21 = vadd.f32 %v1264_v57, %v3569_v25 }
 0x402   :  { %v2392_v24 = vmul.f32 -1.442695, %v2930_v43 }
 0x403   :  { %v2393_v17 = vmul.f32 -1.442695, %v2931_v1  ;;  %v2394_v30 = vmul.f32 -1.442695, %v2947_v21 }
 0x404   :  { %3037 = vpow2.f32 %v2392_v24 }
 0x405   :  { %3039 = vpow2.f32 %v2393_v17 }
 0x406   :  { %3041 = vpow2.f32 %v2394_v30 }
 0x407   :  { %3043 = vtanh.f32 %v2946_v35 }
 0x40e   :  { %v3038_v40 = vpop.eup %3037 }
 0x40f   :  { %v3040_v54 = vpop.eup %3039  ;;  %v1274_v58 = vadd.f32 1.0, %v3038_v40 }
 0x410   :  { %v1280_v59 = vadd.f32 1.0, %v3040_v54  ;;  %v3042_v36 = vpop.eup %3041 }
 0x411   :  { %3045 = vrcp.f32 %v1274_v58  ;;  %v3044_v37 = vpop.eup %3043  ;;  %v1287_v7 = vadd.f32 1.0, %v3042_v36 }
 0x412   :  { %3047 = vrcp.f32 %v1280_v59 }
 0x413   :  { %3049 = vrcp.f32 %v1287_v7 }
 0x41b   :  { %v3046_v41 = vpop.eup %3045 }
 0x41c   :  { %v3048_v56 = vpop.eup %3047  ;;  %v1291_v4 = vmul.f32 %v3046_v41, %v3044_v37 }
 0x41d   :  { %v1290_v13 = vmul.f32 %v3048_v56, %v3826_v14  ;;  %v3050_v22 = vpop.eup %3049 }
 0x41f   :  { %v3967_v20 = vadd.f32 %v1291_v4, %v1290_v13 }
 0x421   :  { %3051 = vtanh.f32 %v3967_v20 }
 0x42b   :  { %v3052_v18 = vpop.eup %3051 }
 0x42c   :  { %v1294_v38 = vmul.f32 %v3052_v18, %v3050_v22 }
 0x42e   :  { %2395 = vst [vmem:[%s4226_s4 + $0x18] sm:$0xff] %v1294_v38  ;;  %1430 = vmatmul.mubr.f32.vlgmr.msra.gmra.mrb[8].mxu0 %v1294_v38  ;;  %1501 = vmatmul.mubr.f32.vlgmr.msra.gmra.mrb[8].mxu1 %v1294_v38  ;;  %v2270_v43 = vmax.f32 %v1294_v38, 0.0 }
 0x42f   :  { %2735 = vmatpush1.bf16.msra.mxu0 %v3649_v50  ;;  %2767 = vmatpush1.bf16.msra.mxu1 %v3658_v55 }
 0x430   :  { %2281 = vadd.xlane.f32.xlu1 %v2270_v43  ;;  %2737 = vmatprep.subr.bf16.mxu0 %v3672_v5 }
 0x431   :  { %2769 = vmatprep.subr.bf16.mxu1 %v3683_v19  ;;  %1669 = vmatprep.mubr.f32.mxu0 %v3117_v3 }
 0x432   :  { %1740 = vmatprep.mubr.f32.mxu1 %v3117_v3 }
 0x433   :  { %2739 = vmatpush1.bf16.msra.mxu0 %v3685_v23  ;;  %2771 = vmatpush1.bf16.msra.mxu1 %v3694_v32 }
 0x434   :  { %2741 = vmatprep.subr.bf16.mxu0 %v3708_v45  ;;  %2773 = vmatprep.subr.bf16.mxu1 %v3719_v60 }
 0x437   :  { %2743 = vmatpush1.bf16.msra.mxu0 %v3721_v0  ;;  %2775 = vmatpush1.bf16.msra.mxu1 %v3730_v12 }
 0x438   :  { %2745 = vmatprep.subr.bf16.mxu0 %v3744_v16  ;;  %2777 = vmatprep.subr.bf16.mxu1 %v3755_v29 }
 0x43b   :  { %2747 = vmatpush1.bf16.msra.mxu0 %v3757_v33  ;;  %2779 = vmatpush1.bf16.msra.mxu1 %v3766_v42 }
 0x43c   :  { %2749 = vmatprep.subr.bf16.mxu0 %v3780_v52  ;;  %2781 = vmatprep.subr.bf16.mxu1 %v3791_v9 }
 0x43f   :  { %2751 = vmatpush1.bf16.msra.mxu0 %v3793_v10  ;;  %2783 = vmatpush1.bf16.msra.mxu1 %v3802_v28 }
 0x440   :  { %2753 = vmatprep.subr.bf16.mxu0 %v3861_v46  ;;  %2785 = vmatprep.subr.bf16.mxu1 %v3872_v2 }
 0x443   :  { %2755 = vmatpush1.bf16.msra.mxu0 %v3874_v15  ;;  %2787 = vmatpush1.bf16.msra.mxu1 %v3886_v26 }
 0x444   :  { %2757 = vmatprep.subr.bf16.mxu0 %v3899_v44  ;;  %2789 = vmatprep.subr.bf16.mxu1 %v3901_v48 }
 0x447   :  { %2759 = vmatpush1.bf16.msra.mxu0 %v3913_v61  ;;  %2791 = vmatpush1.bf16.msra.mxu1 %v3926_v49 }
 0x448   :  { %2761 = vmatprep.subr.bf16.mxu0 %v3928_v53  ;;  %2793 = vmatprep.subr.bf16.mxu1 %v3939_v11 }
 0x44b   :  { %2763 = vmatpush1.bf16.msra.mxu0 %v3951_v27  ;;  %2795 = vmatpush1.bf16.msra.mxu1 %v3955_v34 }
 0x44c   :  { %2797 = vmatprep.subr.bf16.mxu0 %v3636_v39  ;;  %2829 = vmatprep.subr.bf16.mxu1 %v3647_v47 }
 0x501   :  { %v1431_v14 = vpop.f32.mrb[8].mxu0  ;;  %v1502_v51 = vpop.f32.mrb[8].mxu1 }
 0x502   :  { %v2932_v57 = vadd.f32 %v1431_v14, %v3562_v6  ;;  %v1433_v1 = vpop.f32.mrb[9].mxu0  ;;  %v1504_v24 = vpop.f32.mrb[9].mxu1  ;;  %v2948_v54 = vadd.f32 %v1502_v51, %v3573_v31 }
 0x503   :  { %v2933_v17 = vadd.f32 %v1433_v1, %v3564_v8  ;;  %v2949_v35 = vadd.f32 %v1504_v24, %v3569_v25 }
 0x504   :  { %v2396_v21 = vmul.f32 -1.442695, %v2932_v57 }
 0x505   :  { %v2397_v30 = vmul.f32 -1.442695, %v2933_v17  ;;  %v2398_v40 = vmul.f32 -1.442695, %v2949_v35 }
 0x506   :  { %3053 = vpow2.f32 %v2396_v21 }
 0x507   :  { %3055 = vpow2.f32 %v2397_v30 }
 0x508   :  { %3057 = vpow2.f32 %v2398_v40  ;;  %v2022_v40 = vld [vmem:[%s4224_s2 + $0x8] sm:$0xff] }
 0x509   :  { %3059 = vtanh.f32 %v2948_v54  ;;  %v2026_v54 = vld [vmem:[%s4224_s2 + $0x28] sm:$0xff] }
 0x510   :  { %v3054_v39 = vpop.eup %3053 }
 0x511   :  { %v3056_v58 = vpop.eup %3055  ;;  %v1514_v47 = vadd.f32 1.0, %v3054_v39  ;;  %v2024_v39 = vld [vmem:[%s4224_s2 + $0x18] sm:$0xff] }
 0x512   :  { %v1520_v59 = vadd.f32 1.0, %v3056_v58  ;;  %v3058_v36 = vpop.eup %3057  ;;  %v2860_v58 = vpack.c.bf16 %v2026_v54, %v2022_v40  ;;  %v2047_v40 = vld [vmem:[%s4224_s2 + $0xd0] sm:$0xff] }
 0x513   :  { %3061 = vrcp.f32 %v1514_v47  ;;  %v3060_v37 = vpop.eup %3059  ;;  %v1527_v7 = vadd.f32 1.0, %v3058_v36  ;;  %v2028_v47 = vld [vmem:[%s4224_s2 + $0x38] sm:$0xff]  ;;  %v2051_v54 = vld [vmem:[%s4224_s2 + $0xf0] sm:$0xff] }
 0x514   :  { %3063 = vrcp.f32 %v1520_v59  ;;  %v2025_v59 = vld [vmem:[%s4224_s2 + $0x20] sm:$0xff]  ;;  %v2892_v36 = vpack.c.bf16 %v2028_v47, %v2024_v39  ;;  %v2906_v39 = vpack.c.bf16 %v2051_v54, %v2047_v40  ;;  %v2058_v47 = vld [vmem:[%s4224_s2 + $0x128] sm:$0xff] }
 0x515   :  { %3065 = vrcp.f32 %v1527_v7  ;;  %v2030_v7 = vld [vmem:[%s4224_s2 + $0x48] sm:$0xff] }
 0x51d   :  { %v3062_v41 = vpop.eup %3061 }
 0x51e   :  { %v3064_v56 = vpop.eup %3063  ;;  %v1531_v4 = vmul.f32 %v3062_v41, %v3060_v37  ;;  %v2023_v41 = vld [vmem:[%s4224_s2 + $0x10] sm:$0xff] }
 0x51f   :  { %v1530_v13 = vmul.f32 %v3064_v56, %v3967_v20  ;;  %v3066_v18 = vpop.eup %3065  ;;  %v2027_v56 = vld [vmem:[%s4224_s2 + $0x30] sm:$0xff] }
 0x521   :  { %v4012_v22 = vadd.f32 %v1531_v4, %v1530_v13  ;;  %v2894_v4 = vpack.c.bf16 %v2027_v56, %v2023_v41  ;;  %v2034_v13 = vld [vmem:[%s4224_s2 + $0x68] sm:$0xff]  ;;  %v2057_v41 = vld [vmem:[%s4224_s2 + $0x120] sm:$0xff] }
 0x523   :  { %3067 = vtanh.f32 %v4012_v22 }
 0x52d   :  { %v3068_v38 = vpop.eup %3067 }
 0x52e   :  { %v1534_v43 = vmul.f32 %v3068_v38, %v3066_v18  ;;  %v2864_v18 = vpack.c.bf16 %v2034_v13, %v2030_v7  ;;  %v2036_v38 = vld [vmem:[%s4224_s2 + $0x78] sm:$0xff]  ;;  %v2055_v7 = vld [vmem:[%s4224_s2 + $0x110] sm:$0xff] }
 0x52f   :  { %v2059_v13 = vld [vmem:[%s4224_s2 + $0x130] sm:$0xff] }
 0x530   :  { %2399 = vst [vmem:[%s4226_s4 + $0x20] sm:$0xff] %v1534_v43  ;;  %1670 = vmatmul.mubr.f32.vlgmr.msra.gmra.mrb[10].mxu0 %v1534_v43  ;;  %1741 = vmatmul.mubr.f32.vlgmr.msra.gmra.mrb[10].mxu1 %v1534_v43  ;;  %v2271_v14 = vmax.f32 %v1534_v43, 0.0  ;;  %v2029_v43 = vld [vmem:[%s4224_s2 + $0x40] sm:$0xff] }
 0x531   :  { %2799 = vmatpush1.bf16.msra.mxu0 %v3649_v50  ;;  %2831 = vmatpush1.bf16.msra.mxu1 %v3658_v55 }
 0x532   :  { %2283 = vadd.xlane.f32.xlu0 %v2271_v14  ;;  %2801 = vmatprep.subr.bf16.mxu0 %v3672_v5  ;;  %v2033_v14 = vld [vmem:[%s4224_s2 + $0x60] sm:$0xff] }
 0x533   :  { %2833 = vmatprep.subr.bf16.mxu1 %v3683_v19  ;;  %1909 = vmatprep.mubr.f32.mxu0 %v3117_v3 }
 0x534   :  { %1980 = vmatprep.mubr.f32.mxu1 %v3117_v3 }
 0x535   :  { %2803 = vmatpush1.bf16.msra.mxu0 %v3685_v23  ;;  %2835 = vmatpush1.bf16.msra.mxu1 %v3694_v32 }
 0x536   :  { %2805 = vmatprep.subr.bf16.mxu0 %v3708_v45  ;;  %2837 = vmatprep.subr.bf16.mxu1 %v3719_v60 }
 0x539   :  { %2807 = vmatpush1.bf16.msra.mxu0 %v3721_v0  ;;  %2839 = vmatpush1.bf16.msra.mxu1 %v3730_v12 }
 0x53a   :  { %2809 = vmatprep.subr.bf16.mxu0 %v3744_v16  ;;  %2841 = vmatprep.subr.bf16.mxu1 %v3755_v29 }
 0x53d   :  { %2811 = vmatpush1.bf16.msra.mxu0 %v3757_v33  ;;  %2843 = vmatpush1.bf16.msra.mxu1 %v3766_v42 }
 0x53e   :  { %2813 = vmatprep.subr.bf16.mxu0 %v3780_v52  ;;  %2845 = vmatprep.subr.bf16.mxu1 %v3791_v9 }
 0x541   :  { %2815 = vmatpush1.bf16.msra.mxu0 %v3793_v10  ;;  %2847 = vmatpush1.bf16.msra.mxu1 %v3802_v28 }
 0x542   :  { %2817 = vmatprep.subr.bf16.mxu0 %v3861_v46  ;;  %2849 = vmatprep.subr.bf16.mxu1 %v3872_v2 }
 0x545   :  { %2819 = vmatpush1.bf16.msra.mxu0 %v3874_v15  ;;  %2851 = vmatpush1.bf16.msra.mxu1 %v3886_v26 }
 0x546   :  { %2821 = vmatprep.subr.bf16.mxu0 %v3899_v44  ;;  %2853 = vmatprep.subr.bf16.mxu1 %v3901_v48 }
 0x549   :  { %2823 = vmatpush1.bf16.msra.mxu0 %v3913_v61  ;;  %2855 = vmatpush1.bf16.msra.mxu1 %v3926_v49 }
 0x54a   :  { %2825 = vmatprep.subr.bf16.mxu0 %v3928_v53  ;;  %2857 = vmatprep.subr.bf16.mxu1 %v3939_v11 }
 0x54d   :  { %2827 = vmatpush1.bf16.msra.mxu0 %v3951_v27  ;;  %2859 = vmatpush1.bf16.msra.mxu1 %v3955_v34 }
 0x54e   :  { %2861 = vmatprep.subr.bf16.mxu0 %v2860_v58  ;;  %2893 = vmatprep.subr.bf16.mxu1 %v2892_v36  ;;  %v2054_v58 = vld [vmem:[%s4224_s2 + $0x108] sm:$0xff]  ;;  %v2060_v36 = vld [vmem:[%s4224_s2 + $0x138] sm:$0xff] }
 0x603   :  { %v1671_v50 = vpop.f32.mrb[10].mxu0  ;;  %v1742_v55 = vpop.f32.mrb[10].mxu1 }
 0x604   :  { %v2934_v5 = vadd.f32 %v1671_v50, %v3562_v6  ;;  %v1673_v19 = vpop.f32.mrb[11].mxu0  ;;  %v1744_v23 = vpop.f32.mrb[11].mxu1  ;;  %v2950_v16 = vadd.f32 %v1742_v55, %v3573_v31  ;;  %v2866_v55 = vpack.c.bf16 %v2033_v14, %v2029_v43 }
 0x605   :  { %v2935_v32 = vadd.f32 %v1673_v19, %v3564_v8  ;;  %v2951_v0 = vadd.f32 %v1744_v23, %v3569_v25  ;;  %v2035_v19 = vld [vmem:[%s4224_s2 + $0x70] sm:$0xff] }
 0x606   :  { %v2400_v45 = vmul.f32 -1.442695, %v2934_v5  ;;  %v2031_v5 = vld [vmem:[%s4224_s2 + $0x50] sm:$0xff] }
 0x607   :  { %v2401_v60 = vmul.f32 -1.442695, %v2935_v32  ;;  %v2402_v12 = vmul.f32 -1.442695, %v2951_v0  ;;  %v2898_v23 = vpack.c.bf16 %v2035_v19, %v2031_v5  ;;  %v2038_v32 = vld [vmem:[%s4224_s2 + $0x88] sm:$0xff] }
 0x608   :  { %3069 = vpow2.f32 %v2400_v45  ;;  %v2042_v45 = vld [vmem:[%s4224_s2 + $0xa8] sm:$0xff] }
 0x609   :  { %3071 = vpow2.f32 %v2401_v60  ;;  %v2040_v60 = vld [vmem:[%s4224_s2 + $0x98] sm:$0xff]  ;;  %v2868_v0 = vpack.c.bf16 %v2042_v45, %v2038_v32 }
 0x60a   :  { %3073 = vpow2.f32 %v2402_v12  ;;  %v2044_v12 = vld [vmem:[%s4224_s2 + $0xb8] sm:$0xff] }
 0x60b   :  { %3075 = vtanh.f32 %v2950_v16  ;;  %v2037_v16 = vld [vmem:[%s4224_s2 + $0x80] sm:$0xff] }
 0x612   :  { %v3070_v29 = vpop.eup %3069 }
 0x613   :  { %v3072_v33 = vpop.eup %3071  ;;  %v1754_v42 = vadd.f32 1.0, %v3070_v29  ;;  %v2041_v29 = vld [vmem:[%s4224_s2 + $0xa0] sm:$0xff] }
 0x614   :  { %v1760_v52 = vadd.f32 1.0, %v3072_v33  ;;  %v3074_v9 = vpop.eup %3073  ;;  %v2900_v33 = vpack.c.bf16 %v2044_v12, %v2040_v60 }
 0x615   :  { %3077 = vrcp.f32 %v1754_v42  ;;  %v3076_v10 = vpop.eup %3075  ;;  %v1767_v57 = vadd.f32 1.0, %v3074_v9  ;;  %v2870_v42 = vpack.c.bf16 %v2041_v29, %v2037_v16  ;;  %v2043_v9 = vld [vmem:[%s4224_s2 + $0xb0] sm:$0xff] }
 0x616   :  { %3079 = vrcp.f32 %v1760_v52  ;;  %v2039_v52 = vld [vmem:[%s4224_s2 + $0x90] sm:$0xff] }
 0x617   :  { %3081 = vrcp.f32 %v1767_v57 }
 0x61f   :  { %v3078_v28 = vpop.eup %3077 }
 0x620   :  { %v3080_v20 = vpop.eup %3079  ;;  %v1771_v51 = vmul.f32 %v3078_v28, %v3076_v10  ;;  %v2902_v10 = vpack.c.bf16 %v2043_v9, %v2039_v52  ;;  %v2046_v28 = vld [vmem:[%s4224_s2 + $0xc8] sm:$0xff] }
 0x621   :  { %v1770_v1 = vmul.f32 %v3080_v20, %v4012_v22  ;;  %v3082_v17 = vpop.eup %3081  ;;  %v2032_v22 = vld [vmem:[%s4224_s2 + $0x58] sm:$0xff]  ;;  %v2050_v20 = vld [vmem:[%s4224_s2 + $0xe8] sm:$0xff] }
 0x622   :  { %v2896_v50 = vpack.c.bf16 %v2036_v38, %v2032_v22  ;;  %v2872_v57 = vpack.c.bf16 %v2050_v20, %v2046_v28  ;;  %v2910_v22 = vpack.c.bf16 %v2059_v13, %v2055_v7 }
 0x623   :  { %v4055_v24 = vadd.f32 %v1771_v51, %v1770_v1  ;;  %v2048_v51 = vld [vmem:[%s4224_s2 + $0xd8] sm:$0xff] }
 0x624   :  { %v2052_v1 = vld [vmem:[%s4224_s2 + $0xf8] sm:$0xff] }
 0x625   :  { %3083 = vtanh.f32 %v4055_v24 }
 0x62f   :  { %v3084_v21 = vpop.eup %3083 }
 0x630   :  { %v1774_v30 = vmul.f32 %v3084_v21, %v3082_v17  ;;  %v2045_v17 = vld [vmem:[%s4224_s2 + $0xc0] sm:$0xff] }
 0x631   :  { %v2049_v21 = vld [vmem:[%s4224_s2 + $0xe0] sm:$0xff] }
 0x632   :  { %2403 = vst [vmem:[%s4226_s4 + $0x28] sm:$0xff] %v1774_v30  ;;  %1910 = vmatmul.mubr.f32.vlgmr.msra.gmra.mrb[12].mxu0 %v1774_v30  ;;  %1981 = vmatmul.mubr.f32.vlgmr.msra.gmra.mrb[12].mxu1 %v1774_v30  ;;  %v2272_v35 = vmax.f32 %v1774_v30, 0.0  ;;  %v2904_v30 = vpack.c.bf16 %v2052_v1, %v2048_v51 }
 0x633   :  { %2149 = vmatprep.mubr.f32.mxu0 %v3117_v3  ;;  %2220 = vmatprep.mubr.f32.mxu1 %v3117_v3  ;;  %v2021_v3 = vld [vmem:[%s4224_s2] sm:$0xff] }
 0x634   :  { %2285 = vadd.xlane.f32.xlu1 %v2272_v35  ;;  %v2862_v37 = vpack.c.bf16 %v2025_v59, %v2021_v3  ;;  %2895 = vmatpush1.bf16.msra.mxu1 %v2894_v4  ;;  %v2874_v35 = vpack.c.bf16 %v2049_v21, %v2045_v17  ;;  %v2056_v3 = vld [vmem:[%s4224_s2 + $0x118] sm:$0xff]  ;;  %v2876_v59 = vpack.c.bf16 %v2058_v47, %v2054_v58 }
 0x635   :  { %2897 = vmatprep.subr.bf16.mxu1 %v2896_v50  ;;  %v2908_v56 = vpack.c.bf16 %v2060_v36, %v2056_v3  ;;  %v2276_v36 = vpop.xlane.xlu0 %2275 }
 0x636   :  { %2863 = vmatpush1.bf16.msra.mxu0 %v2862_v37  ;;  %v2053_v37 = vld [vmem:[%s4224_s2 + $0x100] sm:$0xff] }
 0x637   :  { %2865 = vmatprep.subr.bf16.mxu0 %v2864_v18  ;;  %v2878_v4 = vpack.c.bf16 %v2057_v41, %v2053_v37  ;;  %v2280_v37 = vpop.xlane.xlu1 %2279  ;;  %v2300_v41 = vand.u32 127, %v35_v62 }
 0x638   :  { %2899 = vmatpush1.bf16.msra.mxu1 %v2898_v23 }
 0x639   :  { %2901 = vmatprep.subr.bf16.mxu1 %v2900_v33  ;;  %v2303_v7 = vsub.s32 %v2300_v41, %v3555_v63 }
 0x63a   :  { %2867 = vmatpush1.bf16.msra.mxu0 %v2866_v55 }
 0x63b   :  { %2869 = vmatprep.subr.bf16.mxu0 %v2868_v0 }
 0x63c   :  { %2903 = vmatpush1.bf16.msra.mxu1 %v2902_v10 }
 0x63d   :  { %2905 = vmatprep.subr.bf16.mxu1 %v2904_v30 }
 0x63e   :  { %2871 = vmatpush1.bf16.msra.mxu0 %v2870_v42 }
 0x63f   :  { %2873 = vmatprep.subr.bf16.mxu0 %v2872_v57 }
 0x640   :  { %2907 = vmatpush1.bf16.msra.mxu1 %v2906_v39 }
 0x641   :  { %2909 = vmatprep.subr.bf16.mxu1 %v2908_v56  ;;  %v2278_v56 = vpop.xlane.xlu0 %2277 }
 0x642   :  { %2875 = vmatpush1.bf16.msra.mxu0 %v2874_v35 }
 0x643   :  { %2877 = vmatprep.subr.bf16.mxu0 %v2876_v59 }
 0x644   :  { %2911 = vmatpush1.bf16.msra.mxu1 %v2910_v22  ;;  %v2308_v22 = vrot.slane %v2278_v56, %v2303_v7 }
 0x645   :  { %2913 = vmatprep.subr.bf16.mxu1 %v3872_v2  ;;  %v2284_v13 = vpop.xlane.xlu0 %2283 }
 0x646   :  { %2879 = vmatpush1.bf16.msra.mxu0 %v2878_v4  ;;  %v2282_v4 = vpop.xlane.xlu1 %2281 }
 0x647   :  { %2881 = vmatprep.subr.bf16.mxu0 %v3861_v46 }
 0x648   :  { %2915 = vmatpush1.bf16.msra.mxu1 %v3886_v26 }
 0x649   :  { %2917 = vmatprep.subr.bf16.mxu1 %v3901_v48 }
 0x64a   :  { %2883 = vmatpush1.bf16.msra.mxu0 %v3874_v15 }
 0x64b   :  { %2885 = vmatprep.subr.bf16.mxu0 %v3899_v44 }
 0x64c   :  { %2919 = vmatpush1.bf16.msra.mxu1 %v3926_v49 }
 0x64d   :  { %2921 = vmatprep.subr.bf16.mxu1 %v3939_v11 }
 0x64e   :  { %2887 = vmatpush1.bf16.msra.mxu0 %v3913_v61 }
 0x64f   :  { %2889 = vmatprep.subr.bf16.mxu0 %v3928_v53 }
 0x650   :  { %2923 = vmatpush1.bf16.msra.mxu1 %v3955_v34 }
 0x652   :  { %2891 = vmatpush1.bf16.msra.mxu0 %v3951_v27 }
 0x705   :  { %v1911_v46 = vpop.f32.mrb[12].mxu0  ;;  %v1982_v2 = vpop.f32.mrb[12].mxu1 }
 0x706   :  { %v2936_v15 = vadd.f32 %v1911_v46, %v3562_v6  ;;  %v1913_v26 = vpop.f32.mrb[13].mxu0  ;;  %v1984_v44 = vpop.f32.mrb[13].mxu1  ;;  %v2952_v11 = vadd.f32 %v1982_v2, %v3573_v31  ;;  %v2312_v46 = vrot.slane %v2280_v37, %v2303_v7 }
 0x707   :  { %v2937_v48 = vadd.f32 %v1913_v26, %v3564_v8  ;;  %v2953_v49 = vadd.f32 %v1984_v44, %v3569_v25  ;;  %v2286_v2 = vpop.xlane.xlu1 %2285  ;;  %v2316_v26 = vrot.slane %v2282_v4, %v2303_v7 }
 0x708   :  { %v2404_v18 = vmul.f32 -1.442695, %v2936_v15  ;;  %v2304_v15 = vrot.slane %v2276_v36, %v2303_v7 }
 0x709   :  { %v2405_v61 = vmul.f32 -1.442695, %v2937_v48  ;;  %v2406_v53 = vmul.f32 -1.442695, %v2953_v49  ;;  %v2320_v48 = vrot.slane %v2284_v13, %v2303_v7 }
 0x70a   :  { %3085 = vpow2.f32 %v2404_v18  ;;  %v2334_v18 = vsel %vm2333_vm1, %v2308_v22, %v2304_v15 }
 0x70b   :  { %3087 = vpow2.f32 %v2405_v61  ;;  %v2324_v61 = vrot.slane %v2286_v2, %v2303_v7  ;;  %v2336_v49 = vsel %vm2335_vm2, %v2312_v46, %v2334_v18 }
 0x70c   :  { %3089 = vpow2.f32 %v2406_v53  ;;  %v2338_v53 = vsel %vm2337_vm3, %v2316_v26, %v2336_v49 }
 0x70d   :  { %3091 = vtanh.f32 %v2952_v11  ;;  %v2340_v63 = vsel %vm2339_vm4, %v2320_v48, %v2338_v53 }
 0x714   :  { %v3086_v27 = vpop.eup %3085 }
 0x715   :  { %v3088_v38 = vpop.eup %3087  ;;  %v1994_v34 = vadd.f32 1.0, %v3086_v27  ;;  %v2342_v27 = vsel %vm2341_vm5, %v2324_v61, %v2340_v63 }
 0x716   :  { %v2000_v43 = vadd.f32 1.0, %v3088_v38  ;;  %v3090_v14 = vpop.eup %3089 }
 0x717   :  { %3093 = vrcp.f32 %v1994_v34  ;;  %v3092_v50 = vpop.eup %3091  ;;  %v2007_v23 = vadd.f32 1.0, %v3090_v14 }
 0x718   :  { %3095 = vrcp.f32 %v2000_v43 }
 0x719   :  { %3097 = vrcp.f32 %v2007_v23 }
 0x721   :  { %v3094_v55 = vpop.eup %3093 }
 0x722   :  { %v3096_v5 = vpop.eup %3095  ;;  %v2011_v19 = vmul.f32 %v3094_v55, %v3092_v50 }
 0x723   :  { %v2010_v32 = vmul.f32 %v3096_v5, %v4055_v24  ;;  %v3098_v60 = vpop.eup %3097 }
 0x725   :  { %v2012_v45 = vadd.f32 %v2011_v19, %v2010_v32 }
 0x727   :  { %3099 = vtanh.f32 %v2012_v45 }
 0x731   :  { %v3100_v0 = vpop.eup %3099 }
 0x732   :  { %v2014_v12 = vmul.f32 %v3100_v0, %v3098_v60 }
 0x734   :  { %2407 = vst [vmem:[%s4226_s4 + $0x30] sm:$0xff] %v2014_v12  ;;  %2150 = vmatmul.mubr.f32.vlgmr.msra.gmra.mrb[14].mxu0 %v2014_v12  ;;  %2221 = vmatmul.mubr.f32.vlgmr.msra.gmra.mrb[14].mxu1 %v2014_v12  ;;  %v2273_v16 = vmax.f32 %v2014_v12, 0.0 }
 0x736   :  { %2287 = vadd.xlane.f32.xlu0 %v2273_v16 }
 0x7c3   :  { %v2288_v44 = vpop.xlane.xlu0 %2287 }
 0x7c4   :  { %v2328_v62 = vrot.slane %v2288_v44, %v2303_v7 }
 0x7c6   :  { %v2344_v34 = vsel %vm2343_vm6, %v2328_v62, %v2342_v27 }
 0x807   :  { %v2151_v29 = vpop.f32.mrb[14].mxu0  ;;  %v2222_v33 = vpop.f32.mrb[14].mxu1 }
 0x808   :  { %v2938_v42 = vadd.f32 %v2151_v29, %v3562_v6  ;;  %v2153_v52 = vpop.f32.mrb[15].mxu0  ;;  %v2224_v24 = vpop.f32.mrb[15].mxu1  ;;  %v2954_v57 = vadd.f32 %v2222_v33, %v3573_v31 }
 0x809   :  { %v2939_v9 = vadd.f32 %v2153_v52, %v3564_v8  ;;  %v2955_v20 = vadd.f32 %v2224_v24, %v3569_v25 }
 0x80a   :  { %v2408_v10 = vmul.f32 -1.442695, %v2938_v42 }
 0x80b   :  { %v2409_v28 = vmul.f32 -1.442695, %v2939_v9  ;;  %v2410_v51 = vmul.f32 -1.442695, %v2955_v20 }
 0x80c   :  { %3101 = vpow2.f32 %v2408_v10 }
 0x80d   :  { %3103 = vpow2.f32 %v2409_v28 }
 0x80e   :  { %3105 = vpow2.f32 %v2410_v51 }
 0x80f   :  { %3107 = vtanh.f32 %v2954_v57 }
 0x816   :  { %v3102_v1 = vpop.eup %3101 }
 0x817   :  { %v3104_v17 = vpop.eup %3103  ;;  %v2234_v21 = vadd.f32 1.0, %v3102_v1 }
 0x818   :  { %v2240_v30 = vadd.f32 1.0, %v3104_v17  ;;  %v3106_v6 = vpop.eup %3105 }
 0x819   :  { %3109 = vrcp.f32 %v2234_v21  ;;  %v3108_v35 = vpop.eup %3107  ;;  %v2247_v39 = vadd.f32 1.0, %v3106_v6 }
 0x81a   :  { %3111 = vrcp.f32 %v2240_v30 }
 0x81b   :  { %3113 = vrcp.f32 %v2247_v39 }
 0x823   :  { %v3110_v8 = vpop.eup %3109 }
 0x824   :  { %v3112_v40 = vpop.eup %3111  ;;  %v2251_v54 = vmul.f32 %v3110_v8, %v3108_v35 }
 0x825   :  { %v2250_v58 = vmul.f32 %v3112_v40, %v2012_v45  ;;  %v3114_v25 = vpop.eup %3113 }
 0x827   :  { %v2252_v47 = vadd.f32 %v2251_v54, %v2250_v58 }
 0x829   :  { %3115 = vtanh.f32 %v2252_v47  ;;  %2258 = vst [vmem:[%s4227_s7] sm:$0xff] %v2252_v47 }
 0x833   :  { %v3116_v31 = vpop.eup %3115 }
 0x834   :  { %v2254_v3 = vmul.f32 %v3116_v31, %v3114_v25 }
 0x836   :  { %2411 = vst [vmem:[%s4226_s4 + $0x38] sm:$0xff] %v2254_v3  ;;  %2257 = vst [vmem:[%s4228_s6] sm:$0xff] %v2254_v3  ;;  %v2274_v59 = vmax.f32 %v2254_v3, 0.0 }
 0x838   :  { %2289 = vadd.xlane.f32.xlu1 %v2274_v59 }
 0x8c5   :  { %v2290_v11 = vpop.xlane.xlu1 %2289 }
 0x8c6   :  { %v2332_v38 = vrot.slane %v2290_v11, %v2303_v7 }
 0x8c8   :  { %v2346_v43 = vsel %vm2345_vm7, %v2332_v38, %v2344_v34 }
 0x8c9   :  { %2348 = vst.msk [vmem:[%s4229_s5] sm:$0xff] %vm55_vm0, %v2346_v43 }

</bundles_post_ra>
